<compile_context>
chip_gen: v7x
topology: tpu7x:2x2x1
jax: 0.10.0
libtpu: 0.0.40
codegen_flags: <defaults>
</compile_context>

<pallas_src>
import jax
import jax.numpy as jnp
from jax import lax
from jax.experimental import pallas as pl
from jax.experimental.pallas import tpu as pltpu

# ----------------------------- config (small) ------------------------------
B = 2            # batch
L = 8            # maxlen == sequence length (gate_bn channel dim)
H = 32           # encoder hidden size (stand-in for 768)
HID = 16         # LSTM hidden size (stand-in for 128)
NUM_LABELS = 2   # config_bert.num_labels
BN_EPS = 1e-5
LANE_PAD = 128   # lane-dense padded width for the logits output


# --------------------------- fused forward kernel ---------------------------
def _fused_kernel(pho_ref, bert_ref,            # [L, H] each (per-batch block)
                  gw_ref,                       # [4, H]  gate weight rows
                  sc_ref, sh0_ref, sh1_ref,     # [L, 1]  folded BN scale/shifts
                  wih_ref,                      # [H, 8*HID]  (fwd | bwd) gates
                  whh_ref,                      # [2*HID, 8*HID] block-diag
                  bias_ref,                     # [1, 8*HID]  b_ih + b_hh
                  cw_ref,                       # [6*HID, LANE_PAD] classifier^T
                  cb_ref,                       # [1, LANE_PAD]
                  out_ref):                     # [1, LANE_PAD] padded logits
    pho = pho_ref[...]                          # [L, H]
    brt = bert_ref[...]                         # [L, H]
    gw = gw_ref[...]                            # [4, H]

    # ---- MoE gate (SpMixtureOfExperts), no lane concat / width-1 slices ----
    # gate logits via VPU multiply + lane reduce (MXU would be idle for N=2).
    g0 = jnp.sum(pho * gw[0:1, :] + brt * gw[1:2, :], axis=-1, keepdims=True)
    g1 = jnp.sum(pho * gw[2:3, :] + brt * gw[3:4, :], axis=-1, keepdims=True)
    # eval-mode BatchNorm1d(maxlen) + gate bias folded into scale/shift.
    g0 = jax.nn.sigmoid(g0 * sc_ref[...] + sh0_ref[...])       # [L, 1]
    g1 = jax.nn.sigmoid(g1 * sc_ref[...] + sh1_ref[...])       # [L, 1]
    x = g0 * pho + g1 * brt                                    # [L, H] mixed

    # ---- BiLSTM: input projection for ALL timesteps, both directions -------
    # One well-shaped matmul; biases (b_ih + b_hh) folded in here, hoisted
    # out of the recurrence.
    xp = jnp.dot(x, wih_ref[...], preferred_element_type=jnp.float32)
    xp = xp + bias_ref[...]                                    # [L, 8*HID]
    xp_f = xp[:, :4 * HID]                                     # fwd gate pre-acts
    xp_b = xp[:, 4 * HID:]                                     # bwd gate pre-acts

    whh = whh_ref[...]                                         # [2*HID, 8*HID]

    def act_ifgo(gates):                                       # [1, 4*HID]
        i = jax.nn.sigmoid(gates[:, 0:HID])
        f = jax.nn.sigmoid(gates[:, HID:2 * HID])
        g = jnp.tanh(gates[:, 2 * HID:3 * HID])
        o = jax.nn.sigmoid(gates[:, 3 * HID:4 * HID])
        return i, f, g, o

    h_cat = jnp.zeros((1, 2 * HID), jnp.float32)               # [h_fwd | h_bwd]
    c_f = jnp.zeros((1, HID), jnp.float32)
    c_b = jnp.zeros((1, HID), jnp.float32)
    hf_outs = [None] * L
    hb_outs = [None] * L

    # Fully unrolled recurrence (L=8): forward processes t, backward L-1-t in
    # the SAME iteration via one block-diagonal recurrent matmul.
    for t in range(L):
        rt = L - 1 - t
        rec = jnp.dot(h_cat, whh, preferred_element_type=jnp.float32)  # [1,8*HID]
        gates_f = rec[:, :4 * HID] + xp_f[t:t + 1, :]
        gates_b = rec[:, 4 * HID:] + xp_b[rt:rt + 1, :]
        i_f, f_f, g_f, o_f = act_ifgo(gates_f)
        i_b, f_b, g_b, o_b = act_ifgo(gates_b)
        c_f = f_f * c_f + i_f * g_f
        c_b = f_b * c_b + i_b * g_b
        h_f = o_f * jnp.tanh(c_f)
        h_b = o_b * jnp.tanh(c_b)
        hf_outs[t] = h_f
        hb_outs[rt] = h_b
        h_cat = jnp.concatenate([h_f, h_b], axis=1)

    # Assemble lstm outputs once (stays in vregs; no HBM round trip).
    lstm_out = jnp.concatenate(
        [jnp.concatenate(hf_outs, axis=0),
         jnp.concatenate(hb_outs, axis=0)], axis=1)            # [L, 2*HID]
    final_hidden = h_cat                                       # [1, 2*HID]

    # ---- dot attention + avg/max pooling + classifier ----------------------
    aw = jnp.sum(lstm_out * final_hidden, axis=-1, keepdims=True)   # [L, 1]
    aw = jax.nn.softmax(aw, axis=0)
    attn = jnp.sum(lstm_out * aw, axis=0, keepdims=True)            # [1, 2*HID]
    avg = jnp.mean(lstm_out, axis=0, keepdims=True)                 # [1, 2*HID]
    mx = jnp.max(lstm_out, axis=0, keepdims=True)                   # [1, 2*HID]
    cat = jnp.concatenate([avg, mx, attn], axis=1)                  # [1, 6*HID]
    # dropout is identity at inference.
    out_ref[...] = (jnp.dot(cat, cw_ref[...],
                            preferred_element_type=jnp.float32)
                    + cb_ref[...])                                  # [1, 128]


# ------------------------------ full forward --------------------------------
@jax.jit
def bert_lstm_attn_forward(seq_phobert, seq_bert, kp):
    full = lambda shape: pl.BlockSpec(shape, lambda b: (0,) * len(shape))
    logits_pad = pl.pallas_call(
        _fused_kernel,
        out_shape=jax.ShapeDtypeStruct((B, 1, LANE_PAD), jnp.float32),
        grid=(B,),
        in_specs=[
            pl.BlockSpec((None, L, H), lambda b: (b, 0, 0)),        # phobert seq
            pl.BlockSpec((None, L, H), lambda b: (b, 0, 0)),        # bert seq
            full((4, H)),                                           # gate rows
            full((L, 1)), full((L, 1)), full((L, 1)),               # BN scale/shifts
            full((H, 8 * HID)),                                     # Wih (both dirs)
            full((2 * HID, 8 * HID)),                               # Whh block-diag
            full((1, 8 * HID)),                                     # LSTM biases
            full((6 * HID, LANE_PAD)),                              # classifier W^T (padded)
            full((1, LANE_PAD)),                                    # classifier b (padded)
        ],
        out_specs=pl.BlockSpec((None, 1, LANE_PAD), lambda b: (b, 0, 0)),
        compiler_params=pltpu.CompilerParams(
            dimension_semantics=("parallel",)),                     # megacore on v7x
    )(seq_phobert, seq_bert, kp["gate_w4"],
      kp["bn_scale"], kp["bn_shift0"], kp["bn_shift1"],
      kp["wih_all"], kp["whh_block"], kp["bias_all"],
      kp["cls_wt"], kp["cls_b"])
    return logits_pad[:, 0, :NUM_LABELS]


# ------------------------- deterministic parameters -------------------------
def init_torch_params(key):
    """PyTorch-layout parameters (distinct keys; no key reuse)."""
    ks = jax.random.split(key, 12)
    bound = 1.0 / jnp.sqrt(HID)

    def uni(k, shape):
        return jax.random.uniform(k, shape, jnp.float32, -bound, bound)

    return {
        # gate = nn.Linear(2*768, 2) (std 0.02 init, zero bias)
        "gate_w": 0.02 * jax.random.normal(ks[0], (2, 2 * H), jnp.float32),
        "gate_b": jnp.zeros((2,), jnp.float32),
        # gate_bn = nn.BatchNorm1d(maxlen), eval mode
        "bn_w": jnp.ones((L,), jnp.float32),
        "bn_b": jnp.zeros((L,), jnp.float32),
        "bn_rm": jnp.zeros((L,), jnp.float32),
        "bn_rv": jnp.ones((L,), jnp.float32),
        # lstm = nn.LSTM(H, HID, bidirectional=True), gates (i, f, g, o)
        "w_ih_f": uni(ks[1], (4 * HID, H)),
        "w_hh_f": uni(ks[2], (4 * HID, HID)),
        "b_ih_f": uni(ks[3], (4 * HID,)),
        "b_hh_f": uni(ks[4], (4 * HID,)),
        "w_ih_b": uni(ks[5], (4 * HID, H)),
        "w_hh_b": uni(ks[6], (4 * HID, HID)),
        "b_ih_b": uni(ks[7], (4 * HID,)),
        "b_hh_b": uni(ks[8], (4 * HID,)),
        # classifier = nn.Linear(6*HID, num_labels)
        "cls_w": 0.02 * jax.random.normal(ks[9], (NUM_LABELS, 6 * HID),
                                          jnp.float32),
        "cls_b": jnp.zeros((NUM_LABELS,), jnp.float32),
    }


def prepare_params(p):
    """Kernel-ready layouts: pre-transposed / pre-folded (hoisted out of the kernel)."""
    # Gate: split [2, 2H] into 4 rows: (pho->g0, bert->g0, pho->g1, bert->g1).
    gw = p["gate_w"]
    gate_w4 = jnp.stack([gw[0, :H], gw[0, H:], gw[1, :H], gw[1, H:]], axis=0)
    # Eval-mode BN folded with the gate bias: sigmoid(g_raw*scale + shift_k).
    scale_1d = p["bn_w"] * lax.rsqrt(p["bn_rv"] + BN_EPS)            # [L]
    shift_1d = p["bn_b"] - p["bn_rm"] * scale_1d                     # [L]
    bn_scale = scale_1d.reshape(L, 1)
    bn_shift0 = (shift_1d + p["gate_b"][0] * scale_1d).reshape(L, 1)
    bn_shift1 = (shift_1d + p["gate_b"][1] * scale_1d).reshape(L, 1)
    # LSTM: pre-transposed input proj for both directions, block-diag Whh,
    # summed biases — all hoisted out of the recurrence.
    wih_all = jnp.concatenate([p["w_ih_f"].T, p["w_ih_b"].T], axis=1)  # [H, 8*HID]
    whh_block = jnp.zeros((2 * HID, 8 * HID), jnp.float32)
    whh_block = whh_block.at[:HID, :4 * HID].set(p["w_hh_f"].T)
    whh_block = whh_block.at[HID:, 4 * HID:].set(p["w_hh_b"].T)
    bias_all = jnp.concatenate([p["b_ih_f"] + p["b_hh_f"],
                                p["b_ih_b"] + p["b_hh_b"]]).reshape(1, 8 * HID)
    # Classifier: pre-transposed and lane-padded to 128 for an unmasked store.
    cls_wt = jnp.zeros((6 * HID, LANE_PAD), jnp.float32)
    cls_wt = cls_wt.at[:, :NUM_LABELS].set(p["cls_w"].T)
    cls_b = jnp.zeros((1, LANE_PAD), jnp.float32)
    cls_b = cls_b.at[0, :NUM_LABELS].set(p["cls_b"])
    return {
        "gate_w4": gate_w4, "bn_scale": bn_scale,
        "bn_shift0": bn_shift0, "bn_shift1": bn_shift1,
        "wih_all": wih_all, "whh_block": whh_block, "bias_all": bias_all,
        "cls_wt": cls_wt, "cls_b": cls_b,
    }


if __name__ == "__main__":
    key = jax.random.PRNGKey(0)
    k_pho, k_bert, k_par = jax.random.split(key, 3)
    seq_phobert = jax.random.normal(k_pho, (B, L, H), jnp.float32)
    seq_bert = jax.random.normal(k_bert, (B, L, H), jnp.float32)
    kernel_params = prepare_params(init_torch_params(k_par))

    logits = bert_lstm_attn_forward(seq_phobert, seq_bert, kernel_params)
    logits = jax.block_until_ready(logits)
    assert logits.shape == (B, NUM_LABELS)
    assert jnp.all(jnp.isfinite(logits))
    print("KERNEL_OK")
</pallas_src>

<mosaic_0001>
module attributes {stable_mosaic.version = 11 : i64} {
  func.func @_fused_kernel(%arg0: i32, %arg1: memref<1x8x32xf32, #tpu.memory_space<vmem>>, %arg2: memref<1x8x32xf32, #tpu.memory_space<vmem>>, %arg3: memref<4x32xf32, #tpu.memory_space<vmem>>, %arg4: memref<8x1xf32, #tpu.memory_space<vmem>>, %arg5: memref<8x1xf32, #tpu.memory_space<vmem>>, %arg6: memref<8x1xf32, #tpu.memory_space<vmem>>, %arg7: memref<32x128xf32, #tpu.memory_space<vmem>>, %arg8: memref<32x128xf32, #tpu.memory_space<vmem>>, %arg9: memref<1x128xf32, #tpu.memory_space<vmem>>, %arg10: memref<96x128xf32, #tpu.memory_space<vmem>>, %arg11: memref<1x128xf32, #tpu.memory_space<vmem>>, %arg12: memref<1x1x128xf32, #tpu.memory_space<vmem>>) attributes {dimension_semantics = [#tpu.dimension_semantics<parallel>], iteration_bounds = array<i64: 2>, scalar_prefetch = 0 : i64, scratch_operands = 0 : i64, tpu.core_type = #tpu.core_type<tc>, window_params = [{transform_indices = @transform_0, window_bounds = array<i64: 1, 8, 32>}, {transform_indices = @transform_1, window_bounds = array<i64: 1, 8, 32>}, {pipeline_mode = #tpu.pipeline_mode<synchronous>, transform_indices = @transform_2, window_bounds = array<i64: 4, 32>}, {pipeline_mode = #tpu.pipeline_mode<synchronous>, transform_indices = @transform_3, window_bounds = array<i64: 8, 1>}, {pipeline_mode = #tpu.pipeline_mode<synchronous>, transform_indices = @transform_4, window_bounds = array<i64: 8, 1>}, {pipeline_mode = #tpu.pipeline_mode<synchronous>, transform_indices = @transform_5, window_bounds = array<i64: 8, 1>}, {pipeline_mode = #tpu.pipeline_mode<synchronous>, transform_indices = @transform_6, window_bounds = array<i64: 32, 128>}, {pipeline_mode = #tpu.pipeline_mode<synchronous>, transform_indices = @transform_7, window_bounds = array<i64: 32, 128>}, {pipeline_mode = #tpu.pipeline_mode<synchronous>, transform_indices = @transform_8, window_bounds = array<i64: 1, 128>}, {pipeline_mode = #tpu.pipeline_mode<synchronous>, transform_indices = @transform_9, window_bounds = array<i64: 96, 128>}, {pipeline_mode = #tpu.pipeline_mode<synchronous>, transform_indices = @transform_10, window_bounds = array<i64: 1, 128>}, {transform_indices = @transform_11, window_bounds = array<i64: 1, 1, 128>}]} {
    %c0 = arith.constant 0 : index
    %c0_0 = arith.constant 0 : index
    %c0_1 = arith.constant 0 : index
    %0 = vector.load %arg1[%c0, %c0_0, %c0_1] : memref<1x8x32xf32, #tpu.memory_space<vmem>>, vector<1x8x32xf32>
    %1 = vector.shape_cast %0 : vector<1x8x32xf32> to vector<8x32xf32>
    %c0_2 = arith.constant 0 : index
    %c0_3 = arith.constant 0 : index
    %c0_4 = arith.constant 0 : index
    %2 = vector.load %arg2[%c0_2, %c0_3, %c0_4] : memref<1x8x32xf32, #tpu.memory_space<vmem>>, vector<1x8x32xf32>
    %3 = vector.shape_cast %2 : vector<1x8x32xf32> to vector<8x32xf32>
    %c0_5 = arith.constant 0 : index
    %c0_6 = arith.constant 0 : index
    %4 = vector.load %arg3[%c0_5, %c0_6] : memref<4x32xf32, #tpu.memory_space<vmem>>, vector<4x32xf32>
    %5 = vector.extract_strided_slice %4 {offsets = [0, 0], sizes = [1, 32], strides = [1, 1]} : vector<4x32xf32> to vector<1x32xf32>
    %6 = vector.broadcast %5 : vector<1x32xf32> to vector<8x32xf32>
    %7 = arith.mulf %1, %6 : vector<8x32xf32>
    %8 = vector.extract_strided_slice %4 {offsets = [1, 0], sizes = [1, 32], strides = [1, 1]} : vector<4x32xf32> to vector<1x32xf32>
    %9 = vector.broadcast %8 : vector<1x32xf32> to vector<8x32xf32>
    %10 = arith.mulf %3, %9 : vector<8x32xf32>
    %11 = arith.addf %7, %10 : vector<8x32xf32>
    %cst = arith.constant dense<0.000000e+00> : vector<8xf32>
    %12 = vector.multi_reduction <add>, %11, %cst [1] : vector<8x32xf32> to vector<8xf32>
    %13 = vector.shape_cast %12 : vector<8xf32> to vector<8x1xf32>
    %14 = vector.extract_strided_slice %4 {offsets = [2, 0], sizes = [1, 32], strides = [1, 1]} : vector<4x32xf32> to vector<1x32xf32>
    %15 = vector.broadcast %14 : vector<1x32xf32> to vector<8x32xf32>
    %16 = arith.mulf %1, %15 : vector<8x32xf32>
    %17 = vector.extract_strided_slice %4 {offsets = [3, 0], sizes = [1, 32], strides = [1, 1]} : vector<4x32xf32> to vector<1x32xf32>
    %18 = vector.broadcast %17 : vector<1x32xf32> to vector<8x32xf32>
    %19 = arith.mulf %3, %18 : vector<8x32xf32>
    %20 = arith.addf %16, %19 : vector<8x32xf32>
    %cst_7 = arith.constant dense<0.000000e+00> : vector<8xf32>
    %21 = vector.multi_reduction <add>, %20, %cst_7 [1] : vector<8x32xf32> to vector<8xf32>
    %22 = vector.shape_cast %21 : vector<8xf32> to vector<8x1xf32>
    %c0_8 = arith.constant 0 : index
    %c0_9 = arith.constant 0 : index
    %23 = vector.load %arg4[%c0_8, %c0_9] : memref<8x1xf32, #tpu.memory_space<vmem>>, vector<8x1xf32>
    %24 = arith.mulf %13, %23 : vector<8x1xf32>
    %c0_10 = arith.constant 0 : index
    %c0_11 = arith.constant 0 : index
    %25 = vector.load %arg5[%c0_10, %c0_11] : memref<8x1xf32, #tpu.memory_space<vmem>>, vector<8x1xf32>
    %26 = arith.addf %24, %25 : vector<8x1xf32>
    %27 = arith.negf %26 : vector<8x1xf32>
    %28 = math.exp %27 : vector<8x1xf32>
    %cst_12 = arith.constant 1.000000e+00 : f32
    %29 = vector.broadcast %cst_12 : f32 to vector<8x1xf32>
    %30 = arith.addf %29, %28 : vector<8x1xf32>
    %31 = arith.divf %29, %30 : vector<8x1xf32>
    %c0_13 = arith.constant 0 : index
    %c0_14 = arith.constant 0 : index
    %32 = vector.load %arg4[%c0_13, %c0_14] : memref<8x1xf32, #tpu.memory_space<vmem>>, vector<8x1xf32>
    %33 = arith.mulf %22, %32 : vector<8x1xf32>
    %c0_15 = arith.constant 0 : index
    %c0_16 = arith.constant 0 : index
    %34 = vector.load %arg6[%c0_15, %c0_16] : memref<8x1xf32, #tpu.memory_space<vmem>>, vector<8x1xf32>
    %35 = arith.addf %33, %34 : vector<8x1xf32>
    %36 = arith.negf %35 : vector<8x1xf32>
    %37 = math.exp %36 : vector<8x1xf32>
    %cst_17 = arith.constant 1.000000e+00 : f32
    %38 = vector.broadcast %cst_17 : f32 to vector<8x1xf32>
    %39 = arith.addf %38, %37 : vector<8x1xf32>
    %40 = arith.divf %38, %39 : vector<8x1xf32>
    %41 = vector.broadcast %31 : vector<8x1xf32> to vector<8x32xf32>
    %42 = arith.mulf %41, %1 : vector<8x32xf32>
    %43 = vector.broadcast %40 : vector<8x1xf32> to vector<8x32xf32>
    %44 = arith.mulf %43, %3 : vector<8x32xf32>
    %45 = arith.addf %42, %44 : vector<8x32xf32>
    %c0_18 = arith.constant 0 : index
    %c0_19 = arith.constant 0 : index
    %46 = vector.load %arg7[%c0_18, %c0_19] : memref<32x128xf32, #tpu.memory_space<vmem>>, vector<32x128xf32>
    %cst_20 = arith.constant dense<0.000000e+00> : vector<8x128xf32>
    %47 = tpu.matmul %45, %46, %cst_20 {dimension_numbers = #tpu.dot_dimension_numbers<[1], [0], [0], [1], [0, 0, 1, 1], [], []>} : vector<8x32xf32>, vector<32x128xf32>, vector<8x128xf32> -> vector<8x128xf32>
    %c0_21 = arith.constant 0 : index
    %c0_22 = arith.constant 0 : index
    %48 = vector.load %arg9[%c0_21, %c0_22] : memref<1x128xf32, #tpu.memory_space<vmem>>, vector<1x128xf32>
    %49 = vector.broadcast %48 : vector<1x128xf32> to vector<8x128xf32>
    %50 = arith.addf %47, %49 : vector<8x128xf32>
    %51 = vector.extract_strided_slice %50 {offsets = [0, 0], sizes = [8, 64], strides = [1, 1]} : vector<8x128xf32> to vector<8x64xf32>
    %52 = vector.extract_strided_slice %50 {offsets = [0, 64], sizes = [8, 64], strides = [1, 1]} : vector<8x128xf32> to vector<8x64xf32>
    %c0_23 = arith.constant 0 : index
    %c0_24 = arith.constant 0 : index
    %53 = vector.load %arg8[%c0_23, %c0_24] : memref<32x128xf32, #tpu.memory_space<vmem>>, vector<32x128xf32>
    %cst_25 = arith.constant 0.000000e+00 : f32
    %54 = vector.broadcast %cst_25 : f32 to vector<1x32xf32>
    %cst_26 = arith.constant 0.000000e+00 : f32
    %55 = vector.broadcast %cst_26 : f32 to vector<1x16xf32>
    %cst_27 = arith.constant 0.000000e+00 : f32
    %56 = vector.broadcast %cst_27 : f32 to vector<1x16xf32>
    %cst_28 = arith.constant dense<0.000000e+00> : vector<1x128xf32>
    %57 = tpu.matmul %54, %53, %cst_28 {dimension_numbers = #tpu.dot_dimension_numbers<[1], [0], [0], [1], [0, 0, 1, 1], [], []>} : vector<1x32xf32>, vector<32x128xf32>, vector<1x128xf32> -> vector<1x128xf32>
    %58 = vector.extract_strided_slice %57 {offsets = [0, 0], sizes = [1, 64], strides = [1, 1]} : vector<1x128xf32> to vector<1x64xf32>
    %59 = vector.extract_strided_slice %51 {offsets = [0, 0], sizes = [1, 64], strides = [1, 1]} : vector<8x64xf32> to vector<1x64xf32>
    %60 = arith.addf %58, %59 : vector<1x64xf32>
    %61 = vector.extract_strided_slice %57 {offsets = [0, 64], sizes = [1, 64], strides = [1, 1]} : vector<1x128xf32> to vector<1x64xf32>
    %62 = vector.extract_strided_slice %52 {offsets = [7, 0], sizes = [1, 64], strides = [1, 1]} : vector<8x64xf32> to vector<1x64xf32>
    %63 = arith.addf %61, %62 : vector<1x64xf32>
    %64 = vector.extract_strided_slice %60 {offsets = [0, 0], sizes = [1, 16], strides = [1, 1]} : vector<1x64xf32> to vector<1x16xf32>
    %65 = arith.negf %64 : vector<1x16xf32>
    %66 = math.exp %65 : vector<1x16xf32>
    %cst_29 = arith.constant 1.000000e+00 : f32
    %67 = vector.broadcast %cst_29 : f32 to vector<1x16xf32>
    %68 = arith.addf %67, %66 : vector<1x16xf32>
    %69 = arith.divf %67, %68 : vector<1x16xf32>
    %70 = vector.extract_strided_slice %60 {offsets = [0, 16], sizes = [1, 16], strides = [1, 1]} : vector<1x64xf32> to vector<1x16xf32>
    %71 = arith.negf %70 : vector<1x16xf32>
    %72 = math.exp %71 : vector<1x16xf32>
    %cst_30 = arith.constant 1.000000e+00 : f32
    %73 = vector.broadcast %cst_30 : f32 to vector<1x16xf32>
    %74 = arith.addf %73, %72 : vector<1x16xf32>
    %75 = arith.divf %73, %74 : vector<1x16xf32>
    %76 = vector.extract_strided_slice %60 {offsets = [0, 32], sizes = [1, 16], strides = [1, 1]} : vector<1x64xf32> to vector<1x16xf32>
    %77 = math.tanh %76 : vector<1x16xf32>
    %78 = vector.extract_strided_slice %60 {offsets = [0, 48], sizes = [1, 16], strides = [1, 1]} : vector<1x64xf32> to vector<1x16xf32>
    %79 = arith.negf %78 : vector<1x16xf32>
    %80 = math.exp %79 : vector<1x16xf32>
    %cst_31 = arith.constant 1.000000e+00 : f32
    %81 = vector.broadcast %cst_31 : f32 to vector<1x16xf32>
    %82 = arith.addf %81, %80 : vector<1x16xf32>
    %83 = arith.divf %81, %82 : vector<1x16xf32>
    %84 = vector.extract_strided_slice %63 {offsets = [0, 0], sizes = [1, 16], strides = [1, 1]} : vector<1x64xf32> to vector<1x16xf32>
    %85 = arith.negf %84 : vector<1x16xf32>
    %86 = math.exp %85 : vector<1x16xf32>
    %cst_32 = arith.constant 1.000000e+00 : f32
    %87 = vector.broadcast %cst_32 : f32 to vector<1x16xf32>
    %88 = arith.addf %87, %86 : vector<1x16xf32>
    %89 = arith.divf %87, %88 : vector<1x16xf32>
    %90 = vector.extract_strided_slice %63 {offsets = [0, 16], sizes = [1, 16], strides = [1, 1]} : vector<1x64xf32> to vector<1x16xf32>
    %91 = arith.negf %90 : vector<1x16xf32>
    %92 = math.exp %91 : vector<1x16xf32>
    %cst_33 = arith.constant 1.000000e+00 : f32
    %93 = vector.broadcast %cst_33 : f32 to vector<1x16xf32>
    %94 = arith.addf %93, %92 : vector<1x16xf32>
    %95 = arith.divf %93, %94 : vector<1x16xf32>
    %96 = vector.extract_strided_slice %63 {offsets = [0, 32], sizes = [1, 16], strides = [1, 1]} : vector<1x64xf32> to vector<1x16xf32>
    %97 = math.tanh %96 : vector<1x16xf32>
    %98 = vector.extract_strided_slice %63 {offsets = [0, 48], sizes = [1, 16], strides = [1, 1]} : vector<1x64xf32> to vector<1x16xf32>
    %99 = arith.negf %98 : vector<1x16xf32>
    %100 = math.exp %99 : vector<1x16xf32>
    %cst_34 = arith.constant 1.000000e+00 : f32
    %101 = vector.broadcast %cst_34 : f32 to vector<1x16xf32>
    %102 = arith.addf %101, %100 : vector<1x16xf32>
    %103 = arith.divf %101, %102 : vector<1x16xf32>
    %104 = arith.mulf %75, %55 : vector<1x16xf32>
    %105 = arith.mulf %69, %77 : vector<1x16xf32>
    %106 = arith.addf %104, %105 : vector<1x16xf32>
    %107 = arith.mulf %95, %56 : vector<1x16xf32>
    %108 = arith.mulf %89, %97 : vector<1x16xf32>
    %109 = arith.addf %107, %108 : vector<1x16xf32>
    %110 = math.tanh %106 : vector<1x16xf32>
    %111 = arith.mulf %83, %110 : vector<1x16xf32>
    %112 = math.tanh %109 : vector<1x16xf32>
    %113 = arith.mulf %103, %112 : vector<1x16xf32>
    %114 = tpu.concatenate %111, %113 in 1 : vector<1x16xf32>, vector<1x16xf32> -> vector<1x32xf32>
    %cst_35 = arith.constant dense<0.000000e+00> : vector<1x128xf32>
    %115 = tpu.matmul %114, %53, %cst_35 {dimension_numbers = #tpu.dot_dimension_numbers<[1], [0], [0], [1], [0, 0, 1, 1], [], []>} : vector<1x32xf32>, vector<32x128xf32>, vector<1x128xf32> -> vector<1x128xf32>
    %116 = vector.extract_strided_slice %115 {offsets = [0, 0], sizes = [1, 64], strides = [1, 1]} : vector<1x128xf32> to vector<1x64xf32>
    %117 = vector.extract_strided_slice %51 {offsets = [1, 0], sizes = [1, 64], strides = [1, 1]} : vector<8x64xf32> to vector<1x64xf32>
    %118 = arith.addf %116, %117 : vector<1x64xf32>
    %119 = vector.extract_strided_slice %115 {offsets = [0, 64], sizes = [1, 64], strides = [1, 1]} : vector<1x128xf32> to vector<1x64xf32>
    %120 = vector.extract_strided_slice %52 {offsets = [6, 0], sizes = [1, 64], strides = [1, 1]} : vector<8x64xf32> to vector<1x64xf32>
    %121 = arith.addf %119, %120 : vector<1x64xf32>
    %122 = vector.extract_strided_slice %118 {offsets = [0, 0], sizes = [1, 16], strides = [1, 1]} : vector<1x64xf32> to vector<1x16xf32>
    %123 = arith.negf %122 : vector<1x16xf32>
    %124 = math.exp %123 : vector<1x16xf32>
    %cst_36 = arith.constant 1.000000e+00 : f32
    %125 = vector.broadcast %cst_36 : f32 to vector<1x16xf32>
    %126 = arith.addf %125, %124 : vector<1x16xf32>
    %127 = arith.divf %125, %126 : vector<1x16xf32>
    %128 = vector.extract_strided_slice %118 {offsets = [0, 16], sizes = [1, 16], strides = [1, 1]} : vector<1x64xf32> to vector<1x16xf32>
    %129 = arith.negf %128 : vector<1x16xf32>
    %130 = math.exp %129 : vector<1x16xf32>
    %cst_37 = arith.constant 1.000000e+00 : f32
    %131 = vector.broadcast %cst_37 : f32 to vector<1x16xf32>
    %132 = arith.addf %131, %130 : vector<1x16xf32>
    %133 = arith.divf %131, %132 : vector<1x16xf32>
    %134 = vector.extract_strided_slice %118 {offsets = [0, 32], sizes = [1, 16], strides = [1, 1]} : vector<1x64xf32> to vector<1x16xf32>
    %135 = math.tanh %134 : vector<1x16xf32>
    %136 = vector.extract_strided_slice %118 {offsets = [0, 48], sizes = [1, 16], strides = [1, 1]} : vector<1x64xf32> to vector<1x16xf32>
    %137 = arith.negf %136 : vector<1x16xf32>
    %138 = math.exp %137 : vector<1x16xf32>
    %cst_38 = arith.constant 1.000000e+00 : f32
    %139 = vector.broadcast %cst_38 : f32 to vector<1x16xf32>
    %140 = arith.addf %139, %138 : vector<1x16xf32>
    %141 = arith.divf %139, %140 : vector<1x16xf32>
    %142 = vector.extract_strided_slice %121 {offsets = [0, 0], sizes = [1, 16], strides = [1, 1]} : vector<1x64xf32> to vector<1x16xf32>
    %143 = arith.negf %142 : vector<1x16xf32>
    %144 = math.exp %143 : vector<1x16xf32>
    %cst_39 = arith.constant 1.000000e+00 : f32
    %145 = vector.broadcast %cst_39 : f32 to vector<1x16xf32>
    %146 = arith.addf %145, %144 : vector<1x16xf32>
    %147 = arith.divf %145, %146 : vector<1x16xf32>
    %148 = vector.extract_strided_slice %121 {offsets = [0, 16], sizes = [1, 16], strides = [1, 1]} : vector<1x64xf32> to vector<1x16xf32>
    %149 = arith.negf %148 : vector<1x16xf32>
    %150 = math.exp %149 : vector<1x16xf32>
    %cst_40 = arith.constant 1.000000e+00 : f32
    %151 = vector.broadcast %cst_40 : f32 to vector<1x16xf32>
    %152 = arith.addf %151, %150 : vector<1x16xf32>
    %153 = arith.divf %151, %152 : vector<1x16xf32>
    %154 = vector.extract_strided_slice %121 {offsets = [0, 32], sizes = [1, 16], strides = [1, 1]} : vector<1x64xf32> to vector<1x16xf32>
    %155 = math.tanh %154 : vector<1x16xf32>
    %156 = vector.extract_strided_slice %121 {offsets = [0, 48], sizes = [1, 16], strides = [1, 1]} : vector<1x64xf32> to vector<1x16xf32>
    %157 = arith.negf %156 : vector<1x16xf32>
    %158 = math.exp %157 : vector<1x16xf32>
    %cst_41 = arith.constant 1.000000e+00 : f32
    %159 = vector.broadcast %cst_41 : f32 to vector<1x16xf32>
    %160 = arith.addf %159, %158 : vector<1x16xf32>
    %161 = arith.divf %159, %160 : vector<1x16xf32>
    %162 = arith.mulf %133, %106 : vector<1x16xf32>
    %163 = arith.mulf %127, %135 : vector<1x16xf32>
    %164 = arith.addf %162, %163 : vector<1x16xf32>
    %165 = arith.mulf %153, %109 : vector<1x16xf32>
    %166 = arith.mulf %147, %155 : vector<1x16xf32>
    %167 = arith.addf %165, %166 : vector<1x16xf32>
    %168 = math.tanh %164 : vector<1x16xf32>
    %169 = arith.mulf %141, %168 : vector<1x16xf32>
    %170 = math.tanh %167 : vector<1x16xf32>
    %171 = arith.mulf %161, %170 : vector<1x16xf32>
    %172 = tpu.concatenate %169, %171 in 1 : vector<1x16xf32>, vector<1x16xf32> -> vector<1x32xf32>
    %cst_42 = arith.constant dense<0.000000e+00> : vector<1x128xf32>
    %173 = tpu.matmul %172, %53, %cst_42 {dimension_numbers = #tpu.dot_dimension_numbers<[1], [0], [0], [1], [0, 0, 1, 1], [], []>} : vector<1x32xf32>, vector<32x128xf32>, vector<1x128xf32> -> vector<1x128xf32>
    %174 = vector.extract_strided_slice %173 {offsets = [0, 0], sizes = [1, 64], strides = [1, 1]} : vector<1x128xf32> to vector<1x64xf32>
    %175 = vector.extract_strided_slice %51 {offsets = [2, 0], sizes = [1, 64], strides = [1, 1]} : vector<8x64xf32> to vector<1x64xf32>
    %176 = arith.addf %174, %175 : vector<1x64xf32>
    %177 = vector.extract_strided_slice %173 {offsets = [0, 64], sizes = [1, 64], strides = [1, 1]} : vector<1x128xf32> to vector<1x64xf32>
    %178 = vector.extract_strided_slice %52 {offsets = [5, 0], sizes = [1, 64], strides = [1, 1]} : vector<8x64xf32> to vector<1x64xf32>
    %179 = arith.addf %177, %178 : vector<1x64xf32>
    %180 = vector.extract_strided_slice %176 {offsets = [0, 0], sizes = [1, 16], strides = [1, 1]} : vector<1x64xf32> to vector<1x16xf32>
    %181 = arith.negf %180 : vector<1x16xf32>
    %182 = math.exp %181 : vector<1x16xf32>
    %cst_43 = arith.constant 1.000000e+00 : f32
    %183 = vector.broadcast %cst_43 : f32 to vector<1x16xf32>
    %184 = arith.addf %183, %182 : vector<1x16xf32>
    %185 = arith.divf %183, %184 : vector<1x16xf32>
    %186 = vector.extract_strided_slice %176 {offsets = [0, 16], sizes = [1, 16], strides = [1, 1]} : vector<1x64xf32> to vector<1x16xf32>
    %187 = arith.negf %186 : vector<1x16xf32>
    %188 = math.exp %187 : vector<1x16xf32>
    %cst_44 = arith.constant 1.000000e+00 : f32
    %189 = vector.broadcast %cst_44 : f32 to vector<1x16xf32>
    %190 = arith.addf %189, %188 : vector<1x16xf32>
    %191 = arith.divf %189, %190 : vector<1x16xf32>
    %192 = vector.extract_strided_slice %176 {offsets = [0, 32], sizes = [1, 16], strides = [1, 1]} : vector<1x64xf32> to vector<1x16xf32>
    %193 = math.tanh %192 : vector<1x16xf32>
    %194 = vector.extract_strided_slice %176 {offsets = [0, 48], sizes = [1, 16], strides = [1, 1]} : vector<1x64xf32> to vector<1x16xf32>
    %195 = arith.negf %194 : vector<1x16xf32>
    %196 = math.exp %195 : vector<1x16xf32>
    %cst_45 = arith.constant 1.000000e+00 : f32
    %197 = vector.broadcast %cst_45 : f32 to vector<1x16xf32>
    %198 = arith.addf %197, %196 : vector<1x16xf32>
    %199 = arith.divf %197, %198 : vector<1x16xf32>
    %200 = vector.extract_strided_slice %179 {offsets = [0, 0], sizes = [1, 16], strides = [1, 1]} : vector<1x64xf32> to vector<1x16xf32>
    %201 = arith.negf %200 : vector<1x16xf32>
    %202 = math.exp %201 : vector<1x16xf32>
    %cst_46 = arith.constant 1.000000e+00 : f32
    %203 = vector.broadcast %cst_46 : f32 to vector<1x16xf32>
    %204 = arith.addf %203, %202 : vector<1x16xf32>
    %205 = arith.divf %203, %204 : vector<1x16xf32>
    %206 = vector.extract_strided_slice %179 {offsets = [0, 16], sizes = [1, 16], strides = [1, 1]} : vector<1x64xf32> to vector<1x16xf32>
    %207 = arith.negf %206 : vector<1x16xf32>
    %208 = math.exp %207 : vector<1x16xf32>
    %cst_47 = arith.constant 1.000000e+00 : f32
    %209 = vector.broadcast %cst_47 : f32 to vector<1x16xf32>
    %210 = arith.addf %209, %208 : vector<1x16xf32>
    %211 = arith.divf %209, %210 : vector<1x16xf32>
    %212 = vector.extract_strided_slice %179 {offsets = [0, 32], sizes = [1, 16], strides = [1, 1]} : vector<1x64xf32> to vector<1x16xf32>
    %213 = math.tanh %212 : vector<1x16xf32>
    %214 = vector.extract_strided_slice %179 {offsets = [0, 48], sizes = [1, 16], strides = [1, 1]} : vector<1x64xf32> to vector<1x16xf32>
    %215 = arith.negf %214 : vector<1x16xf32>
    %216 = math.exp %215 : vector<1x16xf32>
    %cst_48 = arith.constant 1.000000e+00 : f32
    %217 = vector.broadcast %cst_48 : f32 to vector<1x16xf32>
    %218 = arith.addf %217, %216 : vector<1x16xf32>
    %219 = arith.divf %217, %218 : vector<1x16xf32>
    %220 = arith.mulf %191, %164 : vector<1x16xf32>
    %221 = arith.mulf %185, %193 : vector<1x16xf32>
    %222 = arith.addf %220, %221 : vector<1x16xf32>
    %223 = arith.mulf %211, %167 : vector<1x16xf32>
    %224 = arith.mulf %205, %213 : vector<1x16xf32>
    %225 = arith.addf %223, %224 : vector<1x16xf32>
    %226 = math.tanh %222 : vector<1x16xf32>
    %227 = arith.mulf %199, %226 : vector<1x16xf32>
    %228 = math.tanh %225 : vector<1x16xf32>
    %229 = arith.mulf %219, %228 : vector<1x16xf32>
    %230 = tpu.concatenate %227, %229 in 1 : vector<1x16xf32>, vector<1x16xf32> -> vector<1x32xf32>
    %cst_49 = arith.constant dense<0.000000e+00> : vector<1x128xf32>
    %231 = tpu.matmul %230, %53, %cst_49 {dimension_numbers = #tpu.dot_dimension_numbers<[1], [0], [0], [1], [0, 0, 1, 1], [], []>} : vector<1x32xf32>, vector<32x128xf32>, vector<1x128xf32> -> vector<1x128xf32>
    %232 = vector.extract_strided_slice %231 {offsets = [0, 0], sizes = [1, 64], strides = [1, 1]} : vector<1x128xf32> to vector<1x64xf32>
    %233 = vector.extract_strided_slice %51 {offsets = [3, 0], sizes = [1, 64], strides = [1, 1]} : vector<8x64xf32> to vector<1x64xf32>
    %234 = arith.addf %232, %233 : vector<1x64xf32>
    %235 = vector.extract_strided_slice %231 {offsets = [0, 64], sizes = [1, 64], strides = [1, 1]} : vector<1x128xf32> to vector<1x64xf32>
    %236 = vector.extract_strided_slice %52 {offsets = [4, 0], sizes = [1, 64], strides = [1, 1]} : vector<8x64xf32> to vector<1x64xf32>
    %237 = arith.addf %235, %236 : vector<1x64xf32>
    %238 = vector.extract_strided_slice %234 {offsets = [0, 0], sizes = [1, 16], strides = [1, 1]} : vector<1x64xf32> to vector<1x16xf32>
    %239 = arith.negf %238 : vector<1x16xf32>
    %240 = math.exp %239 : vector<1x16xf32>
    %cst_50 = arith.constant 1.000000e+00 : f32
    %241 = vector.broadcast %cst_50 : f32 to vector<1x16xf32>
    %242 = arith.addf %241, %240 : vector<1x16xf32>
    %243 = arith.divf %241, %242 : vector<1x16xf32>
    %244 = vector.extract_strided_slice %234 {offsets = [0, 16], sizes = [1, 16], strides = [1, 1]} : vector<1x64xf32> to vector<1x16xf32>
    %245 = arith.negf %244 : vector<1x16xf32>
    %246 = math.exp %245 : vector<1x16xf32>
    %cst_51 = arith.constant 1.000000e+00 : f32
    %247 = vector.broadcast %cst_51 : f32 to vector<1x16xf32>
    %248 = arith.addf %247, %246 : vector<1x16xf32>
    %249 = arith.divf %247, %248 : vector<1x16xf32>
    %250 = vector.extract_strided_slice %234 {offsets = [0, 32], sizes = [1, 16], strides = [1, 1]} : vector<1x64xf32> to vector<1x16xf32>
    %251 = math.tanh %250 : vector<1x16xf32>
    %252 = vector.extract_strided_slice %234 {offsets = [0, 48], sizes = [1, 16], strides = [1, 1]} : vector<1x64xf32> to vector<1x16xf32>
    %253 = arith.negf %252 : vector<1x16xf32>
    %254 = math.exp %253 : vector<1x16xf32>
    %cst_52 = arith.constant 1.000000e+00 : f32
    %255 = vector.broadcast %cst_52 : f32 to vector<1x16xf32>
    %256 = arith.addf %255, %254 : vector<1x16xf32>
    %257 = arith.divf %255, %256 : vector<1x16xf32>
    %258 = vector.extract_strided_slice %237 {offsets = [0, 0], sizes = [1, 16], strides = [1, 1]} : vector<1x64xf32> to vector<1x16xf32>
    %259 = arith.negf %258 : vector<1x16xf32>
    %260 = math.exp %259 : vector<1x16xf32>
    %cst_53 = arith.constant 1.000000e+00 : f32
    %261 = vector.broadcast %cst_53 : f32 to vector<1x16xf32>
    %262 = arith.addf %261, %260 : vector<1x16xf32>
    %263 = arith.divf %261, %262 : vector<1x16xf32>
    %264 = vector.extract_strided_slice %237 {offsets = [0, 16], sizes = [1, 16], strides = [1, 1]} : vector<1x64xf32> to vector<1x16xf32>
    %265 = arith.negf %264 : vector<1x16xf32>
    %266 = math.exp %265 : vector<1x16xf32>
    %cst_54 = arith.constant 1.000000e+00 : f32
    %267 = vector.broadcast %cst_54 : f32 to vector<1x16xf32>
    %268 = arith.addf %267, %266 : vector<1x16xf32>
    %269 = arith.divf %267, %268 : vector<1x16xf32>
    %270 = vector.extract_strided_slice %237 {offsets = [0, 32], sizes = [1, 16], strides = [1, 1]} : vector<1x64xf32> to vector<1x16xf32>
    %271 = math.tanh %270 : vector<1x16xf32>
    %272 = vector.extract_strided_slice %237 {offsets = [0, 48], sizes = [1, 16], strides = [1, 1]} : vector<1x64xf32> to vector<1x16xf32>
    %273 = arith.negf %272 : vector<1x16xf32>
    %274 = math.exp %273 : vector<1x16xf32>
    %cst_55 = arith.constant 1.000000e+00 : f32
    %275 = vector.broadcast %cst_55 : f32 to vector<1x16xf32>
    %276 = arith.addf %275, %274 : vector<1x16xf32>
    %277 = arith.divf %275, %276 : vector<1x16xf32>
    %278 = arith.mulf %249, %222 : vector<1x16xf32>
    %279 = arith.mulf %243, %251 : vector<1x16xf32>
    %280 = arith.addf %278, %279 : vector<1x16xf32>
    %281 = arith.mulf %269, %225 : vector<1x16xf32>
    %282 = arith.mulf %263, %271 : vector<1x16xf32>
    %283 = arith.addf %281, %282 : vector<1x16xf32>
    %284 = math.tanh %280 : vector<1x16xf32>
    %285 = arith.mulf %257, %284 : vector<1x16xf32>
    %286 = math.tanh %283 : vector<1x16xf32>
    %287 = arith.mulf %277, %286 : vector<1x16xf32>
    %288 = tpu.concatenate %285, %287 in 1 : vector<1x16xf32>, vector<1x16xf32> -> vector<1x32xf32>
    %cst_56 = arith.constant dense<0.000000e+00> : vector<1x128xf32>
    %289 = tpu.matmul %288, %53, %cst_56 {dimension_numbers = #tpu.dot_dimension_numbers<[1], [0], [0], [1], [0, 0, 1, 1], [], []>} : vector<1x32xf32>, vector<32x128xf32>, vector<1x128xf32> -> vector<1x128xf32>
    %290 = vector.extract_strided_slice %289 {offsets = [0, 0], sizes = [1, 64], strides = [1, 1]} : vector<1x128xf32> to vector<1x64xf32>
    %291 = vector.extract_strided_slice %51 {offsets = [4, 0], sizes = [1, 64], strides = [1, 1]} : vector<8x64xf32> to vector<1x64xf32>
    %292 = arith.addf %290, %291 : vector<1x64xf32>
    %293 = vector.extract_strided_slice %289 {offsets = [0, 64], sizes = [1, 64], strides = [1, 1]} : vector<1x128xf32> to vector<1x64xf32>
    %294 = vector.extract_strided_slice %52 {offsets = [3, 0], sizes = [1, 64], strides = [1, 1]} : vector<8x64xf32> to vector<1x64xf32>
    %295 = arith.addf %293, %294 : vector<1x64xf32>
    %296 = vector.extract_strided_slice %292 {offsets = [0, 0], sizes = [1, 16], strides = [1, 1]} : vector<1x64xf32> to vector<1x16xf32>
    %297 = arith.negf %296 : vector<1x16xf32>
    %298 = math.exp %297 : vector<1x16xf32>
    %cst_57 = arith.constant 1.000000e+00 : f32
    %299 = vector.broadcast %cst_57 : f32 to vector<1x16xf32>
    %300 = arith.addf %299, %298 : vector<1x16xf32>
    %301 = arith.divf %299, %300 : vector<1x16xf32>
    %302 = vector.extract_strided_slice %292 {offsets = [0, 16], sizes = [1, 16], strides = [1, 1]} : vector<1x64xf32> to vector<1x16xf32>
    %303 = arith.negf %302 : vector<1x16xf32>
    %304 = math.exp %303 : vector<1x16xf32>
    %cst_58 = arith.constant 1.000000e+00 : f32
    %305 = vector.broadcast %cst_58 : f32 to vector<1x16xf32>
    %306 = arith.addf %305, %304 : vector<1x16xf32>
    %307 = arith.divf %305, %306 : vector<1x16xf32>
    %308 = vector.extract_strided_slice %292 {offsets = [0, 32], sizes = [1, 16], strides = [1, 1]} : vector<1x64xf32> to vector<1x16xf32>
    %309 = math.tanh %308 : vector<1x16xf32>
    %310 = vector.extract_strided_slice %292 {offsets = [0, 48], sizes = [1, 16], strides = [1, 1]} : vector<1x64xf32> to vector<1x16xf32>
    %311 = arith.negf %310 : vector<1x16xf32>
    %312 = math.exp %311 : vector<1x16xf32>
    %cst_59 = arith.constant 1.000000e+00 : f32
    %313 = vector.broadcast %cst_59 : f32 to vector<1x16xf32>
    %314 = arith.addf %313, %312 : vector<1x16xf32>
    %315 = arith.divf %313, %314 : vector<1x16xf32>
    %316 = vector.extract_strided_slice %295 {offsets = [0, 0], sizes = [1, 16], strides = [1, 1]} : vector<1x64xf32> to vector<1x16xf32>
    %317 = arith.negf %316 : vector<1x16xf32>
    %318 = math.exp %317 : vector<1x16xf32>
    %cst_60 = arith.constant 1.000000e+00 : f32
    %319 = vector.broadcast %cst_60 : f32 to vector<1x16xf32>
    %320 = arith.addf %319, %318 : vector<1x16xf32>
    %321 = arith.divf %319, %320 : vector<1x16xf32>
    %322 = vector.extract_strided_slice %295 {offsets = [0, 16], sizes = [1, 16], strides = [1, 1]} : vector<1x64xf32> to vector<1x16xf32>
    %323 = arith.negf %322 : vector<1x16xf32>
    %324 = math.exp %323 : vector<1x16xf32>
    %cst_61 = arith.constant 1.000000e+00 : f32
    %325 = vector.broadcast %cst_61 : f32 to vector<1x16xf32>
    %326 = arith.addf %325, %324 : vector<1x16xf32>
    %327 = arith.divf %325, %326 : vector<1x16xf32>
    %328 = vector.extract_strided_slice %295 {offsets = [0, 32], sizes = [1, 16], strides = [1, 1]} : vector<1x64xf32> to vector<1x16xf32>
    %329 = math.tanh %328 : vector<1x16xf32>
    %330 = vector.extract_strided_slice %295 {offsets = [0, 48], sizes = [1, 16], strides = [1, 1]} : vector<1x64xf32> to vector<1x16xf32>
    %331 = arith.negf %330 : vector<1x16xf32>
    %332 = math.exp %331 : vector<1x16xf32>
    %cst_62 = arith.constant 1.000000e+00 : f32
    %333 = vector.broadcast %cst_62 : f32 to vector<1x16xf32>
    %334 = arith.addf %333, %332 : vector<1x16xf32>
    %335 = arith.divf %333, %334 : vector<1x16xf32>
    %336 = arith.mulf %307, %280 : vector<1x16xf32>
    %337 = arith.mulf %301, %309 : vector<1x16xf32>
    %338 = arith.addf %336, %337 : vector<1x16xf32>
    %339 = arith.mulf %327, %283 : vector<1x16xf32>
    %340 = arith.mulf %321, %329 : vector<1x16xf32>
    %341 = arith.addf %339, %340 : vector<1x16xf32>
    %342 = math.tanh %338 : vector<1x16xf32>
    %343 = arith.mulf %315, %342 : vector<1x16xf32>
    %344 = math.tanh %341 : vector<1x16xf32>
    %345 = arith.mulf %335, %344 : vector<1x16xf32>
    %346 = tpu.concatenate %343, %345 in 1 : vector<1x16xf32>, vector<1x16xf32> -> vector<1x32xf32>
    %cst_63 = arith.constant dense<0.000000e+00> : vector<1x128xf32>
    %347 = tpu.matmul %346, %53, %cst_63 {dimension_numbers = #tpu.dot_dimension_numbers<[1], [0], [0], [1], [0, 0, 1, 1], [], []>} : vector<1x32xf32>, vector<32x128xf32>, vector<1x128xf32> -> vector<1x128xf32>
    %348 = vector.extract_strided_slice %347 {offsets = [0, 0], sizes = [1, 64], strides = [1, 1]} : vector<1x128xf32> to vector<1x64xf32>
    %349 = vector.extract_strided_slice %51 {offsets = [5, 0], sizes = [1, 64], strides = [1, 1]} : vector<8x64xf32> to vector<1x64xf32>
    %350 = arith.addf %348, %349 : vector<1x64xf32>
    %351 = vector.extract_strided_slice %347 {offsets = [0, 64], sizes = [1, 64], strides = [1, 1]} : vector<1x128xf32> to vector<1x64xf32>
    %352 = vector.extract_strided_slice %52 {offsets = [2, 0], sizes = [1, 64], strides = [1, 1]} : vector<8x64xf32> to vector<1x64xf32>
    %353 = arith.addf %351, %352 : vector<1x64xf32>
    %354 = vector.extract_strided_slice %350 {offsets = [0, 0], sizes = [1, 16], strides = [1, 1]} : vector<1x64xf32> to vector<1x16xf32>
    %355 = arith.negf %354 : vector<1x16xf32>
    %356 = math.exp %355 : vector<1x16xf32>
    %cst_64 = arith.constant 1.000000e+00 : f32
    %357 = vector.broadcast %cst_64 : f32 to vector<1x16xf32>
    %358 = arith.addf %357, %356 : vector<1x16xf32>
    %359 = arith.divf %357, %358 : vector<1x16xf32>
    %360 = vector.extract_strided_slice %350 {offsets = [0, 16], sizes = [1, 16], strides = [1, 1]} : vector<1x64xf32> to vector<1x16xf32>
    %361 = arith.negf %360 : vector<1x16xf32>
    %362 = math.exp %361 : vector<1x16xf32>
    %cst_65 = arith.constant 1.000000e+00 : f32
    %363 = vector.broadcast %cst_65 : f32 to vector<1x16xf32>
    %364 = arith.addf %363, %362 : vector<1x16xf32>
    %365 = arith.divf %363, %364 : vector<1x16xf32>
    %366 = vector.extract_strided_slice %350 {offsets = [0, 32], sizes = [1, 16], strides = [1, 1]} : vector<1x64xf32> to vector<1x16xf32>
    %367 = math.tanh %366 : vector<1x16xf32>
    %368 = vector.extract_strided_slice %350 {offsets = [0, 48], sizes = [1, 16], strides = [1, 1]} : vector<1x64xf32> to vector<1x16xf32>
    %369 = arith.negf %368 : vector<1x16xf32>
    %370 = math.exp %369 : vector<1x16xf32>
    %cst_66 = arith.constant 1.000000e+00 : f32
    %371 = vector.broadcast %cst_66 : f32 to vector<1x16xf32>
    %372 = arith.addf %371, %370 : vector<1x16xf32>
    %373 = arith.divf %371, %372 : vector<1x16xf32>
    %374 = vector.extract_strided_slice %353 {offsets = [0, 0], sizes = [1, 16], strides = [1, 1]} : vector<1x64xf32> to vector<1x16xf32>
    %375 = arith.negf %374 : vector<1x16xf32>
    %376 = math.exp %375 : vector<1x16xf32>
    %cst_67 = arith.constant 1.000000e+00 : f32
    %377 = vector.broadcast %cst_67 : f32 to vector<1x16xf32>
    %378 = arith.addf %377, %376 : vector<1x16xf32>
    %379 = arith.divf %377, %378 : vector<1x16xf32>
    %380 = vector.extract_strided_slice %353 {offsets = [0, 16], sizes = [1, 16], strides = [1, 1]} : vector<1x64xf32> to vector<1x16xf32>
    %381 = arith.negf %380 : vector<1x16xf32>
    %382 = math.exp %381 : vector<1x16xf32>
    %cst_68 = arith.constant 1.000000e+00 : f32
    %383 = vector.broadcast %cst_68 : f32 to vector<1x16xf32>
    %384 = arith.addf %383, %382 : vector<1x16xf32>
    %385 = arith.divf %383, %384 : vector<1x16xf32>
    %386 = vector.extract_strided_slice %353 {offsets = [0, 32], sizes = [1, 16], strides = [1, 1]} : vector<1x64xf32> to vector<1x16xf32>
    %387 = math.tanh %386 : vector<1x16xf32>
    %388 = vector.extract_strided_slice %353 {offsets = [0, 48], sizes = [1, 16], strides = [1, 1]} : vector<1x64xf32> to vector<1x16xf32>
    %389 = arith.negf %388 : vector<1x16xf32>
    %390 = math.exp %389 : vector<1x16xf32>
    %cst_69 = arith.constant 1.000000e+00 : f32
    %391 = vector.broadcast %cst_69 : f32 to vector<1x16xf32>
    %392 = arith.addf %391, %390 : vector<1x16xf32>
    %393 = arith.divf %391, %392 : vector<1x16xf32>
    %394 = arith.mulf %365, %338 : vector<1x16xf32>
    %395 = arith.mulf %359, %367 : vector<1x16xf32>
    %396 = arith.addf %394, %395 : vector<1x16xf32>
    %397 = arith.mulf %385, %341 : vector<1x16xf32>
    %398 = arith.mulf %379, %387 : vector<1x16xf32>
    %399 = arith.addf %397, %398 : vector<1x16xf32>
    %400 = math.tanh %396 : vector<1x16xf32>
    %401 = arith.mulf %373, %400 : vector<1x16xf32>
    %402 = math.tanh %399 : vector<1x16xf32>
    %403 = arith.mulf %393, %402 : vector<1x16xf32>
    %404 = tpu.concatenate %401, %403 in 1 : vector<1x16xf32>, vector<1x16xf32> -> vector<1x32xf32>
    %cst_70 = arith.constant dense<0.000000e+00> : vector<1x128xf32>
    %405 = tpu.matmul %404, %53, %cst_70 {dimension_numbers = #tpu.dot_dimension_numbers<[1], [0], [0], [1], [0, 0, 1, 1], [], []>} : vector<1x32xf32>, vector<32x128xf32>, vector<1x128xf32> -> vector<1x128xf32>
    %406 = vector.extract_strided_slice %405 {offsets = [0, 0], sizes = [1, 64], strides = [1, 1]} : vector<1x128xf32> to vector<1x64xf32>
    %407 = vector.extract_strided_slice %51 {offsets = [6, 0], sizes = [1, 64], strides = [1, 1]} : vector<8x64xf32> to vector<1x64xf32>
    %408 = arith.addf %406, %407 : vector<1x64xf32>
    %409 = vector.extract_strided_slice %405 {offsets = [0, 64], sizes = [1, 64], strides = [1, 1]} : vector<1x128xf32> to vector<1x64xf32>
    %410 = vector.extract_strided_slice %52 {offsets = [1, 0], sizes = [1, 64], strides = [1, 1]} : vector<8x64xf32> to vector<1x64xf32>
    %411 = arith.addf %409, %410 : vector<1x64xf32>
    %412 = vector.extract_strided_slice %408 {offsets = [0, 0], sizes = [1, 16], strides = [1, 1]} : vector<1x64xf32> to vector<1x16xf32>
    %413 = arith.negf %412 : vector<1x16xf32>
    %414 = math.exp %413 : vector<1x16xf32>
    %cst_71 = arith.constant 1.000000e+00 : f32
    %415 = vector.broadcast %cst_71 : f32 to vector<1x16xf32>
    %416 = arith.addf %415, %414 : vector<1x16xf32>
    %417 = arith.divf %415, %416 : vector<1x16xf32>
    %418 = vector.extract_strided_slice %408 {offsets = [0, 16], sizes = [1, 16], strides = [1, 1]} : vector<1x64xf32> to vector<1x16xf32>
    %419 = arith.negf %418 : vector<1x16xf32>
    %420 = math.exp %419 : vector<1x16xf32>
    %cst_72 = arith.constant 1.000000e+00 : f32
    %421 = vector.broadcast %cst_72 : f32 to vector<1x16xf32>
    %422 = arith.addf %421, %420 : vector<1x16xf32>
    %423 = arith.divf %421, %422 : vector<1x16xf32>
    %424 = vector.extract_strided_slice %408 {offsets = [0, 32], sizes = [1, 16], strides = [1, 1]} : vector<1x64xf32> to vector<1x16xf32>
    %425 = math.tanh %424 : vector<1x16xf32>
    %426 = vector.extract_strided_slice %408 {offsets = [0, 48], sizes = [1, 16], strides = [1, 1]} : vector<1x64xf32> to vector<1x16xf32>
    %427 = arith.negf %426 : vector<1x16xf32>
    %428 = math.exp %427 : vector<1x16xf32>
    %cst_73 = arith.constant 1.000000e+00 : f32
    %429 = vector.broadcast %cst_73 : f32 to vector<1x16xf32>
    %430 = arith.addf %429, %428 : vector<1x16xf32>
    %431 = arith.divf %429, %430 : vector<1x16xf32>
    %432 = vector.extract_strided_slice %411 {offsets = [0, 0], sizes = [1, 16], strides = [1, 1]} : vector<1x64xf32> to vector<1x16xf32>
    %433 = arith.negf %432 : vector<1x16xf32>
    %434 = math.exp %433 : vector<1x16xf32>
    %cst_74 = arith.constant 1.000000e+00 : f32
    %435 = vector.broadcast %cst_74 : f32 to vector<1x16xf32>
    %436 = arith.addf %435, %434 : vector<1x16xf32>
    %437 = arith.divf %435, %436 : vector<1x16xf32>
    %438 = vector.extract_strided_slice %411 {offsets = [0, 16], sizes = [1, 16], strides = [1, 1]} : vector<1x64xf32> to vector<1x16xf32>
    %439 = arith.negf %438 : vector<1x16xf32>
    %440 = math.exp %439 : vector<1x16xf32>
    %cst_75 = arith.constant 1.000000e+00 : f32
    %441 = vector.broadcast %cst_75 : f32 to vector<1x16xf32>
    %442 = arith.addf %441, %440 : vector<1x16xf32>
    %443 = arith.divf %441, %442 : vector<1x16xf32>
    %444 = vector.extract_strided_slice %411 {offsets = [0, 32], sizes = [1, 16], strides = [1, 1]} : vector<1x64xf32> to vector<1x16xf32>
    %445 = math.tanh %444 : vector<1x16xf32>
    %446 = vector.extract_strided_slice %411 {offsets = [0, 48], sizes = [1, 16], strides = [1, 1]} : vector<1x64xf32> to vector<1x16xf32>
    %447 = arith.negf %446 : vector<1x16xf32>
    %448 = math.exp %447 : vector<1x16xf32>
    %cst_76 = arith.constant 1.000000e+00 : f32
    %449 = vector.broadcast %cst_76 : f32 to vector<1x16xf32>
    %450 = arith.addf %449, %448 : vector<1x16xf32>
    %451 = arith.divf %449, %450 : vector<1x16xf32>
    %452 = arith.mulf %423, %396 : vector<1x16xf32>
    %453 = arith.mulf %417, %425 : vector<1x16xf32>
    %454 = arith.addf %452, %453 : vector<1x16xf32>
    %455 = arith.mulf %443, %399 : vector<1x16xf32>
    %456 = arith.mulf %437, %445 : vector<1x16xf32>
    %457 = arith.addf %455, %456 : vector<1x16xf32>
    %458 = math.tanh %454 : vector<1x16xf32>
    %459 = arith.mulf %431, %458 : vector<1x16xf32>
    %460 = math.tanh %457 : vector<1x16xf32>
    %461 = arith.mulf %451, %460 : vector<1x16xf32>
    %462 = tpu.concatenate %459, %461 in 1 : vector<1x16xf32>, vector<1x16xf32> -> vector<1x32xf32>
    %cst_77 = arith.constant dense<0.000000e+00> : vector<1x128xf32>
    %463 = tpu.matmul %462, %53, %cst_77 {dimension_numbers = #tpu.dot_dimension_numbers<[1], [0], [0], [1], [0, 0, 1, 1], [], []>} : vector<1x32xf32>, vector<32x128xf32>, vector<1x128xf32> -> vector<1x128xf32>
    %464 = vector.extract_strided_slice %463 {offsets = [0, 0], sizes = [1, 64], strides = [1, 1]} : vector<1x128xf32> to vector<1x64xf32>
    %465 = vector.extract_strided_slice %51 {offsets = [7, 0], sizes = [1, 64], strides = [1, 1]} : vector<8x64xf32> to vector<1x64xf32>
    %466 = arith.addf %464, %465 : vector<1x64xf32>
    %467 = vector.extract_strided_slice %463 {offsets = [0, 64], sizes = [1, 64], strides = [1, 1]} : vector<1x128xf32> to vector<1x64xf32>
    %468 = vector.extract_strided_slice %52 {offsets = [0, 0], sizes = [1, 64], strides = [1, 1]} : vector<8x64xf32> to vector<1x64xf32>
    %469 = arith.addf %467, %468 : vector<1x64xf32>
    %470 = vector.extract_strided_slice %466 {offsets = [0, 0], sizes = [1, 16], strides = [1, 1]} : vector<1x64xf32> to vector<1x16xf32>
    %471 = arith.negf %470 : vector<1x16xf32>
    %472 = math.exp %471 : vector<1x16xf32>
    %cst_78 = arith.constant 1.000000e+00 : f32
    %473 = vector.broadcast %cst_78 : f32 to vector<1x16xf32>
    %474 = arith.addf %473, %472 : vector<1x16xf32>
    %475 = arith.divf %473, %474 : vector<1x16xf32>
    %476 = vector.extract_strided_slice %466 {offsets = [0, 16], sizes = [1, 16], strides = [1, 1]} : vector<1x64xf32> to vector<1x16xf32>
    %477 = arith.negf %476 : vector<1x16xf32>
    %478 = math.exp %477 : vector<1x16xf32>
    %cst_79 = arith.constant 1.000000e+00 : f32
    %479 = vector.broadcast %cst_79 : f32 to vector<1x16xf32>
    %480 = arith.addf %479, %478 : vector<1x16xf32>
    %481 = arith.divf %479, %480 : vector<1x16xf32>
    %482 = vector.extract_strided_slice %466 {offsets = [0, 32], sizes = [1, 16], strides = [1, 1]} : vector<1x64xf32> to vector<1x16xf32>
    %483 = math.tanh %482 : vector<1x16xf32>
    %484 = vector.extract_strided_slice %466 {offsets = [0, 48], sizes = [1, 16], strides = [1, 1]} : vector<1x64xf32> to vector<1x16xf32>
    %485 = arith.negf %484 : vector<1x16xf32>
    %486 = math.exp %485 : vector<1x16xf32>
    %cst_80 = arith.constant 1.000000e+00 : f32
    %487 = vector.broadcast %cst_80 : f32 to vector<1x16xf32>
    %488 = arith.addf %487, %486 : vector<1x16xf32>
    %489 = arith.divf %487, %488 : vector<1x16xf32>
    %490 = vector.extract_strided_slice %469 {offsets = [0, 0], sizes = [1, 16], strides = [1, 1]} : vector<1x64xf32> to vector<1x16xf32>
    %491 = arith.negf %490 : vector<1x16xf32>
    %492 = math.exp %491 : vector<1x16xf32>
    %cst_81 = arith.constant 1.000000e+00 : f32
    %493 = vector.broadcast %cst_81 : f32 to vector<1x16xf32>
    %494 = arith.addf %493, %492 : vector<1x16xf32>
    %495 = arith.divf %493, %494 : vector<1x16xf32>
    %496 = vector.extract_strided_slice %469 {offsets = [0, 16], sizes = [1, 16], strides = [1, 1]} : vector<1x64xf32> to vector<1x16xf32>
    %497 = arith.negf %496 : vector<1x16xf32>
    %498 = math.exp %497 : vector<1x16xf32>
    %cst_82 = arith.constant 1.000000e+00 : f32
    %499 = vector.broadcast %cst_82 : f32 to vector<1x16xf32>
    %500 = arith.addf %499, %498 : vector<1x16xf32>
    %501 = arith.divf %499, %500 : vector<1x16xf32>
    %502 = vector.extract_strided_slice %469 {offsets = [0, 32], sizes = [1, 16], strides = [1, 1]} : vector<1x64xf32> to vector<1x16xf32>
    %503 = math.tanh %502 : vector<1x16xf32>
    %504 = vector.extract_strided_slice %469 {offsets = [0, 48], sizes = [1, 16], strides = [1, 1]} : vector<1x64xf32> to vector<1x16xf32>
    %505 = arith.negf %504 : vector<1x16xf32>
    %506 = math.exp %505 : vector<1x16xf32>
    %cst_83 = arith.constant 1.000000e+00 : f32
    %507 = vector.broadcast %cst_83 : f32 to vector<1x16xf32>
    %508 = arith.addf %507, %506 : vector<1x16xf32>
    %509 = arith.divf %507, %508 : vector<1x16xf32>
    %510 = arith.mulf %481, %454 : vector<1x16xf32>
    %511 = arith.mulf %475, %483 : vector<1x16xf32>
    %512 = arith.addf %510, %511 : vector<1x16xf32>
    %513 = arith.mulf %501, %457 : vector<1x16xf32>
    %514 = arith.mulf %495, %503 : vector<1x16xf32>
    %515 = arith.addf %513, %514 : vector<1x16xf32>
    %516 = math.tanh %512 : vector<1x16xf32>
    %517 = arith.mulf %489, %516 : vector<1x16xf32>
    %518 = math.tanh %515 : vector<1x16xf32>
    %519 = arith.mulf %509, %518 : vector<1x16xf32>
    %520 = tpu.concatenate %517, %519 in 1 : vector<1x16xf32>, vector<1x16xf32> -> vector<1x32xf32>
    %521 = tpu.concatenate %111, %169, %227, %285, %343, %401, %459, %517 in 0 : vector<1x16xf32>, vector<1x16xf32>, vector<1x16xf32>, vector<1x16xf32>, vector<1x16xf32>, vector<1x16xf32>, vector<1x16xf32>, vector<1x16xf32> -> vector<8x16xf32>
    %522 = tpu.concatenate %519, %461, %403, %345, %287, %229, %171, %113 in 0 : vector<1x16xf32>, vector<1x16xf32>, vector<1x16xf32>, vector<1x16xf32>, vector<1x16xf32>, vector<1x16xf32>, vector<1x16xf32>, vector<1x16xf32> -> vector<8x16xf32>
    %523 = tpu.concatenate %521, %522 in 1 : vector<8x16xf32>, vector<8x16xf32> -> vector<8x32xf32>
    %524 = vector.broadcast %520 : vector<1x32xf32> to vector<8x32xf32>
    %525 = arith.mulf %523, %524 : vector<8x32xf32>
    %cst_84 = arith.constant dense<0.000000e+00> : vector<8xf32>
    %526 = vector.multi_reduction <add>, %525, %cst_84 [1] : vector<8x32xf32> to vector<8xf32>
    %527 = vector.shape_cast %526 : vector<8xf32> to vector<8x1xf32>
    %cst_85 = arith.constant dense<0xFF800000> : vector<1xf32>
    %528 = vector.multi_reduction <maximumf>, %527, %cst_85 [0] : vector<8x1xf32> to vector<1xf32>
    %cst_86 = arith.constant 0xFF800000 : f32
    %529 = vector.broadcast %cst_86 : f32 to vector<1xf32>
    %530 = arith.maximumf %529, %528 : vector<1xf32>
    %531 = vector.shape_cast %530 : vector<1xf32> to vector<1x1xf32>
    %532 = vector.broadcast %531 : vector<1x1xf32> to vector<8x1xf32>
    %533 = arith.subf %527, %532 : vector<8x1xf32>
    %534 = math.exp %533 : vector<8x1xf32>
    %cst_87 = arith.constant dense<0.000000e+00> : vector<1xf32>
    %535 = vector.multi_reduction <add>, %534, %cst_87 [0] : vector<8x1xf32> to vector<1xf32>
    %536 = vector.shape_cast %535 : vector<1xf32> to vector<1x1xf32>
    %537 = vector.broadcast %536 : vector<1x1xf32> to vector<8x1xf32>
    %538 = arith.divf %534, %537 : vector<8x1xf32>
    %539 = vector.broadcast %538 : vector<8x1xf32> to vector<8x32xf32>
    %540 = arith.mulf %523, %539 : vector<8x32xf32>
    %cst_88 = arith.constant dense<0.000000e+00> : vector<32xf32>
    %541 = vector.multi_reduction <add>, %540, %cst_88 [0] : vector<8x32xf32> to vector<32xf32>
    %542 = vector.shape_cast %541 : vector<32xf32> to vector<1x32xf32>
    %cst_89 = arith.constant dense<0.000000e+00> : vector<32xf32>
    %543 = vector.multi_reduction <add>, %523, %cst_89 [0] : vector<8x32xf32> to vector<32xf32>
    %544 = vector.shape_cast %543 : vector<32xf32> to vector<1x32xf32>
    %cst_90 = arith.constant 8.000000e+00 : f32
    %545 = vector.broadcast %cst_90 : f32 to vector<1x32xf32>
    %546 = arith.divf %544, %545 : vector<1x32xf32>
    %cst_91 = arith.constant dense<0xFF800000> : vector<32xf32>
    %547 = vector.multi_reduction <maximumf>, %523, %cst_91 [0] : vector<8x32xf32> to vector<32xf32>
    %548 = vector.shape_cast %547 : vector<32xf32> to vector<1x32xf32>
    %549 = tpu.concatenate %546, %548, %542 in 1 : vector<1x32xf32>, vector<1x32xf32>, vector<1x32xf32> -> vector<1x96xf32>
    %c0_92 = arith.constant 0 : index
    %c0_93 = arith.constant 0 : index
    %550 = vector.load %arg10[%c0_92, %c0_93] : memref<96x128xf32, #tpu.memory_space<vmem>>, vector<96x128xf32>
    %cst_94 = arith.constant dense<0.000000e+00> : vector<1x128xf32>
    %551 = tpu.matmul %549, %550, %cst_94 {dimension_numbers = #tpu.dot_dimension_numbers<[1], [0], [0], [1], [0, 0, 1, 1], [], []>} : vector<1x96xf32>, vector<96x128xf32>, vector<1x128xf32> -> vector<1x128xf32>
    %c0_95 = arith.constant 0 : index
    %c0_96 = arith.constant 0 : index
    %552 = vector.load %arg11[%c0_95, %c0_96] : memref<1x128xf32, #tpu.memory_space<vmem>>, vector<1x128xf32>
    %553 = arith.addf %551, %552 : vector<1x128xf32>
    %c0_97 = arith.constant 0 : index
    %c0_98 = arith.constant 0 : index
    %c0_99 = arith.constant 0 : index
    %554 = vector.load %arg12[%c0_97, %c0_98, %c0_99] : memref<1x1x128xf32, #tpu.memory_space<vmem>>, vector<1x1x128xf32>
    %555 = vector.shape_cast %554 : vector<1x1x128xf32> to vector<1x128xf32>
    %556 = vector.shape_cast %553 : vector<1x128xf32> to vector<1x1x128xf32>
    tpu.vector_store %arg12[%c0_97, %c0_98, %c0_99], %556 {strides = array<i32>} : memref<1x1x128xf32, #tpu.memory_space<vmem>>, vector<1x1x128xf32>,
    return
  }
  func.func @transform_0(%arg0: i32) -> (i32, i32, i32) {
    %c0_i32 = arith.constant 0 : i32
    %c0_i32_0 = arith.constant 0 : i32
    %c0_i32_1 = arith.constant 0 : i32
    return %arg0, %c0_i32, %c0_i32_0 : i32, i32, i32
  }
  func.func @transform_1(%arg0: i32) -> (i32, i32, i32) {
    %c0_i32 = arith.constant 0 : i32
    %c0_i32_0 = arith.constant 0 : i32
    %c0_i32_1 = arith.constant 0 : i32
    return %arg0, %c0_i32, %c0_i32_0 : i32, i32, i32
  }
  func.func @transform_2(%arg0: i32) -> (i32, i32) {
    %c0_i32 = arith.constant 0 : i32
    %c0_i32_0 = arith.constant 0 : i32
    %c0_i32_1 = arith.constant 0 : i32
    return %c0_i32, %c0_i32_0 : i32, i32
  }
  func.func @transform_3(%arg0: i32) -> (i32, i32) {
    %c0_i32 = arith.constant 0 : i32
    %c0_i32_0 = arith.constant 0 : i32
    %c0_i32_1 = arith.constant 0 : i32
    return %c0_i32, %c0_i32_0 : i32, i32
  }
  func.func @transform_4(%arg0: i32) -> (i32, i32) {
    %c0_i32 = arith.constant 0 : i32
    %c0_i32_0 = arith.constant 0 : i32
    %c0_i32_1 = arith.constant 0 : i32
    return %c0_i32, %c0_i32_0 : i32, i32
  }
  func.func @transform_5(%arg0: i32) -> (i32, i32) {
    %c0_i32 = arith.constant 0 : i32
    %c0_i32_0 = arith.constant 0 : i32
    %c0_i32_1 = arith.constant 0 : i32
    return %c0_i32, %c0_i32_0 : i32, i32
  }
  func.func @transform_6(%arg0: i32) -> (i32, i32) {
    %c0_i32 = arith.constant 0 : i32
    %c0_i32_0 = arith.constant 0 : i32
    %c0_i32_1 = arith.constant 0 : i32
    return %c0_i32, %c0_i32_0 : i32, i32
  }
  func.func @transform_7(%arg0: i32) -> (i32, i32) {
    %c0_i32 = arith.constant 0 : i32
    %c0_i32_0 = arith.constant 0 : i32
    %c0_i32_1 = arith.constant 0 : i32
    return %c0_i32, %c0_i32_0 : i32, i32
  }
  func.func @transform_8(%arg0: i32) -> (i32, i32) {
    %c0_i32 = arith.constant 0 : i32
    %c0_i32_0 = arith.constant 0 : i32
    %c0_i32_1 = arith.constant 0 : i32
    return %c0_i32, %c0_i32_0 : i32, i32
  }
  func.func @transform_9(%arg0: i32) -> (i32, i32) {
    %c0_i32 = arith.constant 0 : i32
    %c0_i32_0 = arith.constant 0 : i32
    %c0_i32_1 = arith.constant 0 : i32
    return %c0_i32, %c0_i32_0 : i32, i32
  }
  func.func @transform_10(%arg0: i32) -> (i32, i32) {
    %c0_i32 = arith.constant 0 : i32
    %c0_i32_0 = arith.constant 0 : i32
    %c0_i32_1 = arith.constant 0 : i32
    return %c0_i32, %c0_i32_0 : i32, i32
  }
  func.func @transform_11(%arg0: i32) -> (i32, i32, i32) {
    %c0_i32 = arith.constant 0 : i32
    %c0_i32_0 = arith.constant 0 : i32
    %c0_i32_1 = arith.constant 0 : i32
    return %arg0, %c0_i32, %c0_i32_0 : i32, i32, i32
  }
}

</mosaic_0001>

<bundles_post_ra>
// kernel: bert_lstm_attn_forward.1
= control target key start
LH: loop header
LB: loop body
LE: loop exit
PB: predicated region body
PF: predicated region fallthrough
CT: control target
= control target key end

     0   :  { %s3551_s0 = inlined_call_operand.hbm [shape: f32[2,8,32], index: 0, kind: input, shape index: {}]   ;;  %s3552_s1 = inlined_call_operand.hbm [shape: f32[2,8,32], index: 1, kind: input, shape index: {}]   ;;  %s3553_s2 = inlined_call_operand.hbm [shape: f32[4,32], index: 2, kind: input, shape index: {}]   ;;  %s3554_s3 = inlined_call_operand.vmem [shape: f32[8,1], index: 3, kind: input, shape index: {}]   ;;  %s3555_s4 = inlined_call_operand.vmem [shape: f32[8,1], index: 4, kind: input, shape index: {}]   ;;  %s3556_s5 = inlined_call_operand.vmem [shape: f32[8,1], index: 5, kind: input, shape index: {}]   ;;  %s3557_s6 = inlined_call_operand.vmem [shape: f32[32,128], index: 6, kind: input, shape index: {}]   ;;  %s3558_s7 = inlined_call_operand.vmem [shape: f32[32,128], index: 7, kind: input, shape index: {}]   ;;  %s3559_s8 = inlined_call_operand.hbm [shape: f32[1,128], index: 8, kind: input, shape index: {}]   ;;  %s3560_s9 = inlined_call_operand.hbm [shape: f32[96,128], index: 9, kind: input, shape index: {}]   ;;  %s3561_s10 = inlined_call_operand.hbm [shape: f32[1,128], index: 10, kind: input, shape index: {}]   ;;  %s3562_s11 = inlined_call_operand.hbm [shape: f32[2,1,128], index: 11, kind: output, shape index: {}]  }
   0x1   :  { %3571 = sst [smem:[#allocation23_spill]] %s3553_s2 }
   0x2   :  { %3572 = sst [smem:[#allocation24_spill]] %s3559_s8 }
   0x3   :  { %3573 = sst [smem:[#allocation25_spill]] %s3560_s9 }
   0x4   :  { %3574 = sst [smem:[#allocation26_spill]] %s3561_s10 }
   0x5   :  { %3575 = sst [smem:[#allocation27_spill]] %s3562_s11 }
   0x6   :  { %16 = vsyncpa [#allocation3], 0 }
   0x7   :  { %18 = vsyncpa [#allocation3 + $0x1], 0 }
   0x8   :  { %19 = vsyncpa [#allocation6], 0 }
   0x9   :  { %21 = vsyncpa [#allocation6 + $0x1], 0 }
   0xa   :  { %22 = vsyncpa [#allocation9], 0 }
   0xb   :  { %23 = vsyncpa [#allocation12], 0 }
   0xc   :  { %24 = vsyncpa [#allocation4], 0 }
   0xd   :  { %26 = vsyncpa [#allocation4 + $0x1], 0  ;;  %s2944_s17 = smov 0   ;;  %s2946_s18 = smov 0  }
   0xe   :  { %s2948_s19 = smov 0   ;;  %s2950_s20 = smov 0  }
   0xf LB: > { %3576 = sst [smem:[#allocation20_spill]] %s2860_s19  ;;  %s2866_s21 = smov [#allocation7]   ;;  %s2864_s20 = sphi %s2950_s20, %s3604_s20   ;;  %s2860_s19 = sphi %s2948_s19, %s3609_s19   ;;  %s2856_s18 = sphi %s2946_s18, %s3608_s18   ;;  %s2852_s17 = sphi %s2944_s17, %s3607_s17  }
  0x10   : > { %s317_s22 = sshll.u32 %s2866_s21, 4  ;;  %s2965_s23 = sadd.s32 4294967295, %s2864_s20   ;;  %s318_s22 = int_to_ptr.vmem [resolvable:$true] %s317_s22 }
  0x11   : > { %p2061_p0 = scmp.ge.s32.totalorder %s2864_s20, 1  ;;  %p3563_p1 = scmp.eq.s32.totalorder %s2965_s23, 0 }
  0x12   : > { %p304_p2 = scmp.lt.s32.totalorder %s2864_s20, 3  ;;  %s2867_s25 = smov [#allocation8]  }
  0x13   : > { %s343_s26 = sshll.u32 %s2867_s25, 4  ;;  %s2868_s27 = smov [#allocation10]   ;;  %s2977_s26 = int_to_ptr.vmem [resolvable:$true] %s343_s26 }
  0x14   : > { %p2970_p3 = pnand %p2061_p0, %p304_p2  ;;  %s353_s28 = sshll.u32 %s2868_s27, 4  ;;  %s2985_s28 = int_to_ptr.vmem [resolvable:$true] %s353_s28 }
  0x15   : > { %s3579_s2 = sld [smem:[#allocation23_spill]] }
  0x16   : > { %s3577_s24 = scalar_select %p2970_p3, 1, 0 }
  0x17   : > { %p2387_p5 = pneg %p2970_p3 }
  0x19   : > { %p2981_p6 = pnand %p2387_p5, %p3563_p1 }
  0x1b   : > { %s2610_s13 = scalar_lea.hbm %s3579_s2, 64  ;;  %p2995_p8 = pneg %p2981_p6 }
  0x1c   : > { %p2611_p7 = scmp.ne.s32.totalorder %s3579_s2, %s2610_s13  ;;  %p2617_p11 = scmp.lt.u32.totalorder %s2610_s13, %s3579_s2 }
  0x1e   : > { %p2613_p9 = pnand %p2995_p8, %p2611_p7 }
  0x20   : > { %p2614_p10 = pneg %p2613_p9 }
  0x22   : > { %p2619_p12 = pnand %p2617_p11, %p2614_p10 }
  0x24   : > { %2622 = shalt.err (!%p2619_p12)
}
  0x25   : > { %s2623_s27 = scalar_lea.vmem %s318_s22, 64  ;;  %p2631_p5 = scmp.lt.s32.totalorder %s318_s22, %s318_s22 }
  0x26   : > { %p2624_p13 = scmp.ne.s32.totalorder %s318_s22, %s2623_s27  ;;  %p2632_p4 = scmp.lt.s32.totalorder %s2623_s27, %s2623_s27 }
  0x28   : > { %p2626_p0 = pnand %p2624_p13, %p2995_p8  ;;  %p2633_p1 = por %p2632_p4, %p2631_p5 }
  0x2a   : > { %p2627_p2 = pneg %p2626_p0 }
  0x2c   : > { %p2634_p3 = pnand %p2633_p1, %p2627_p2 }
  0x2e   : > { %2637 = shalt.err (!%p2634_p3)
}
  0x2f   : > { %2390 = dma.hbm_to_vmem [thread:$0]  (!%p2981_p6), %s3579_s2, 64, %s318_s22, [#allocation6]  }
  0x30   : > { %s3581_s8 = sld [smem:[#allocation24_spill]] }
  0x36   : > { %s2638_s15 = scalar_lea.hbm %s3581_s8, 16 }
  0x37   : > { %p2639_p7 = scmp.ne.s32.totalorder %s3581_s8, %s2638_s15  ;;  %p2645_p1 = scmp.lt.u32.totalorder %s2638_s15, %s3581_s8 }
  0x39   : > { %p2641_p9 = pnand %p2639_p7, %p2995_p8 }
  0x3b   : > { %p2642_p4 = pneg %p2641_p9 }
  0x3d   : > { %p2647_p3 = pnand %p2645_p1, %p2642_p4 }
  0x3f   : > { %2650 = shalt.err (!%p2647_p3)
}
  0x40   : > { %s2651_s22 = scalar_lea.vmem %s2977_s26, 16  ;;  %s2658_s30 = scalar_lea.vmem %s2977_s26, 32 }
  0x41   : > { %p2652_p10 = scmp.ne.s32.totalorder %s2977_s26, %s2651_s22  ;;  %p2659_p13 = scmp.lt.s32.totalorder %s2977_s26, %s2977_s26 }
  0x42   : > { %p2660_p0 = scmp.lt.s32.totalorder %s2658_s30, %s2651_s22 }
  0x43   : > { %p2654_p11 = pnand %p2652_p10, %p2995_p8 }
  0x44   : > { %p2661_p2 = por %p2660_p0, %p2659_p13 }
  0x45   : > { %p2655_p12 = pneg %p2654_p11 }
  0x47   : > { %p2662_p5 = pnand %p2661_p2, %p2655_p12 }
  0x49   : > { %2665 = shalt.err (!%p2662_p5)
}
  0x4a   : > { %2393 = dma.hbm_to_vmem [thread:$0]  (!%p2981_p6), %s3581_s8, 16, %s2977_s26, [#allocation9]  }
  0x4b   : > { %s3582_s9 = sld [smem:[#allocation25_spill]] }
  0x51   : > { %s2666_s15 = scalar_lea.hbm %s3582_s9, 1536 }
  0x52   : > { %p2667_p7 = scmp.ne.s32.totalorder %s3582_s9, %s2666_s15  ;;  %p2673_p1 = scmp.lt.u32.totalorder %s2666_s15, %s3582_s9 }
  0x54   : > { %p2669_p9 = pnand %p2667_p7, %p2995_p8 }
  0x56   : > { %p2670_p4 = pneg %p2669_p9 }
  0x58   : > { %p2675_p3 = pnand %p2673_p1, %p2670_p4 }
  0x5a   : > { %2678 = shalt.err (!%p2675_p3)
}
  0x5b   : > { %s2679_s26 = scalar_lea.vmem %s2985_s28, 1536  ;;  %p2687_p13 = scmp.lt.s32.totalorder %s2985_s28, %s2985_s28 }
  0x5c   : > { %p2680_p10 = scmp.ne.s32.totalorder %s2985_s28, %s2679_s26  ;;  %p2688_p0 = scmp.lt.s32.totalorder %s2679_s26, %s2679_s26 }
  0x5e   : > { %p2682_p11 = pnand %p2680_p10, %p2995_p8  ;;  %p2689_p2 = por %p2688_p0, %p2687_p13 }
  0x60   : > { %p2683_p12 = pneg %p2682_p11 }
  0x62   : > { %p2690_p5 = pnand %p2689_p2, %p2683_p12 }
  0x64   : > { %2693 = shalt.err (!%p2690_p5)
}
  0x65   : > { %s2869_s30 = smov 128   ;;  %s2870_s11 = smov 8  }
  0x66   : > { %2396 = dma.hbm_to_vmem [thread:$0]  (!%p2981_p6), %s3582_s9, 1536, %s2985_s28, [#allocation9], %s2869_s30, %s2869_s30, %s2870_s11  }
  0x67   : > { %s2871_s14 = smov [#allocation11]   ;;  %s3583_s10 = sld [smem:[#allocation26_spill]] }
  0x68   : > { %s367_s15 = sshll.u32 %s2871_s14, 4  ;;  %s368_s15 = int_to_ptr.vmem [resolvable:$true] %s367_s15 }
  0x6d   : > { %s2694_s27 = scalar_lea.hbm %s3583_s10, 16 }
  0x6e   : > { %p2695_p7 = scmp.ne.s32.totalorder %s3583_s10, %s2694_s27  ;;  %p2701_p1 = scmp.lt.u32.totalorder %s2694_s27, %s3583_s10 }
  0x70   : > { %p2697_p9 = pnand %p2695_p7, %p2995_p8 }
  0x72   : > { %p2698_p4 = pneg %p2697_p9 }
  0x74   : > { %p2703_p3 = pnand %p2701_p1, %p2698_p4 }
  0x76   : > { %2706 = shalt.err (!%p2703_p3)
}
  0x77   : > { %s2707_s28 = scalar_lea.vmem %s368_s15, 16  ;;  %s2714_s30 = scalar_lea.vmem %s368_s15, 32 }
  0x78   : > { %p2708_p10 = scmp.ne.s32.totalorder %s368_s15, %s2707_s28  ;;  %p2715_p13 = scmp.lt.s32.totalorder %s368_s15, %s368_s15 }
  0x79   : > { %p2716_p0 = scmp.lt.s32.totalorder %s2714_s30, %s2707_s28 }
  0x7a   : > { %p2710_p11 = pnand %p2708_p10, %p2995_p8 }
  0x7b   : > { %p2717_p2 = por %p2716_p0, %p2715_p13 }
  0x7c   : > { %p2711_p12 = pneg %p2710_p11 }
  0x7e   : > { %p2718_p5 = pnand %p2717_p2, %p2711_p12 }
  0x80   : > { %2721 = shalt.err (!%p2718_p5)
}
  0x81   : > { %2399 = dma.hbm_to_vmem [thread:$0]  (!%p2981_p6), %s3583_s10, 16, %s368_s15, [#allocation12]  }
  0x82   : > { %s2060_s2 = sadd.s32 4294967294, %s2864_s20   ;;  %s3078_s8 = sadd.s32 1, %s2864_s20  }
  0x83   : > { %3584 = sst [smem:[#allocation21_spill]] %s3078_s8  ;;  %s36_s29 = ssub.s32 %s2864_s20, %s3078_s8 }
  0x84   : > { %s39_s16 = sadd.s32 1, %s2860_s19  ;;  %p37_p8 = scmp.eq.s32.totalorder %s36_s29, 0 }
  0x85   : > { %p46_p7 = scmp.ne.s32.totalorder %s2860_s19, %s2856_s18  ;;  %p47_p9 = scmp.eq.s32.totalorder %s2864_s20, 0 }
  0x86   : > { %p52_p4 = scmp.ne.s32.totalorder %s2856_s18, %s2852_s17  ;;  %p3587_p3 = scmp.eq.s32.totalorder %s2965_s23, 0 }
  0x87   : > { %s3089_s13 = scalar_select %p37_p8, %s2860_s19, %s39_s16  }
  0x88   : > { %p3091_p1 = por %p47_p9, %p46_p7  ;;  %p3097_p6 = por %p3587_p3, %p52_p4 }
  0x89   : > { %3585 = sst [smem:[#allocation22_spill]] %s3089_s13  ;;  %p291_p10 = scmp.eq.s32.totalorder %s2965_s23, 1 }
  0x8a   : > { %s3588_s15 = scalar_select %p3097_p6, 1, 0 }
  0x8b   : > { %p297_p11 = scmp.eq.s32.totalorder %s2060_s2, 1  ;;  %p2415_p12 = scmp.lt.s32.totalorder %s2864_s20, 2 }
  0x8c   : > { %s378_s21 = sand.u32 1, %s2860_s19   ;;  %p3104_p13 = por %p291_p10, %p46_p7 }
  0x8d   : > { %p3108_p0 = por %p297_p11, %p52_p4  ;;  %s3112_s22 = sshll.u32 %s378_s21, 3 }
  0x8e   : > { %s3589_s25 = scalar_select %p3104_p13, 1, 0 }
  0x8f   : > { %s3590_s27 = scalar_select %p3108_p0, 1, 0 }
  0x90   : > { %s2068_s26 = sshll.u32 %s2864_s20, 7  ;;  %s382_s12 = scalar_lea.vmem [#allocation2], %s3112_s22 }
  0x91   : > { %s3118_s11 = scalar_lea.hbm %s3551_s0, %s2068_s26  ;;  %s389_s2 = sshll.u32 %s382_s12, 4  ;;  %s3121_s2 = int_to_ptr.vmem [resolvable:$true] %s389_s2 }
  0x92   : > { %p3125_p2 = pnand %p2415_p12, %p3091_p1  ;;  %s3132_s28 = scalar_lea.hbm %s3552_s1, %s2068_s26 }
  0x93   : > { %s396_s30 = sand.u32 1, %s2864_s20   ;;  %s379_s10 = scalar_lea.sflag [#allocation3], %s378_s21 }
  0x94   : > { %s2722_s13 = scalar_lea.hbm %s3118_s11, 128  ;;  %p2724_p8 = pneg %p3125_p2 }
  0x95   : > { %p2723_p5 = scmp.ne.s32.totalorder %s3118_s11, %s2722_s13  ;;  %s2727_s19 = scalar_lea.hbm %s3551_s0, 256 }
  0x96   : > { %p2728_p4 = scmp.lt.u32.totalorder %s3118_s11, %s3551_s0  ;;  %p2729_p1 = scmp.lt.u32.totalorder %s2727_s19, %s2722_s13 }
  0x97   : > { %p2725_p7 = pnand %p2724_p8, %p2723_p5  ;;  %p2731_p10 = scmp.lt.u32.totalorder %s2722_s13, %s3118_s11 }
  0x98   : > { %p2730_p3 = por %p2729_p1, %p2728_p4 }
  0x99   : > { %p2726_p9 = pneg %p2725_p7 }
  0x9a   : > { %p2732_p11 = por %p2731_p10, %p2730_p3 }
  0x9c   : > { %p2733_p12 = pnand %p2732_p11, %p2726_p9 }
  0x9e   : > { %2736 = shalt.err (!%p2733_p12)
}
  0x9f   : > { %s2737_s21 = scalar_lea.vmem %s3121_s2, 128  ;;  %s2872_s26 = smov [#allocation2]  }
  0xa0   : > { %p2738_p5 = scmp.ne.s32.totalorder %s3121_s2, %s2737_s21  ;;  %s2742_s16 = sshll.u32 %s2872_s26, 4  ;;  %s2743_s16 = int_to_ptr.vmem [resolvable:$false] %s2742_s16 }
  0xa1   : > { %s2744_s8 = scalar_lea.vmem %s2743_s16, 256  ;;  %p2745_p13 = scmp.lt.s32.totalorder %s3121_s2, %s2743_s16 }
  0xa2   : > { %p2740_p7 = pnand %p2738_p5, %p2724_p8  ;;  %p2746_p4 = scmp.lt.s32.totalorder %s2744_s8, %s2737_s21 }
  0xa4   : > { %p2741_p0 = pneg %p2740_p7  ;;  %p2747_p1 = por %p2746_p4, %p2745_p13 }
  0xa6   : > { %p2748_p3 = pnand %p2747_p1, %p2741_p0 }
  0xa8   : > { %2751 = shalt.err (!%p2748_p3)
}
  0xa9   : > { %2403 = dma.hbm_to_vmem [thread:$0]  (!%p3125_p2), %s3118_s11, 128, %s3121_s2, %s379_s10  }
  0xaa   : > { %s400_s19 = scalar_lea.vmem [#allocation5], %s3112_s22  ;;  %s397_s14 = scalar_lea.sflag [#allocation6], %s396_s30 }
  0xab   : > { %s407_s13 = sshll.u32 %s400_s19, 4  ;;  %s2752_s12 = scalar_lea.hbm %s3132_s28, 128  ;;  %s408_s13 = int_to_ptr.vmem [resolvable:$true] %s407_s13 }
  0xac   : > { %p2753_p13 = scmp.ne.s32.totalorder %s3132_s28, %s2752_s12  ;;  %s2757_s26 = scalar_lea.hbm %s3552_s1, 256 }
  0xad   : > { %p2758_p10 = scmp.lt.u32.totalorder %s3132_s28, %s3552_s1  ;;  %p2759_p11 = scmp.lt.u32.totalorder %s2757_s26, %s2752_s12 }
  0xae   : > { %p2755_p0 = pnand %p2753_p13, %p2724_p8  ;;  %p2761_p5 = scmp.lt.u32.totalorder %s2752_s12, %s3132_s28 }
  0xaf   : > { %p2760_p12 = por %p2759_p11, %p2758_p10 }
  0xb0   : > { %p2756_p9 = pneg %p2755_p0 }
  0xb1   : > { %p2762_p7 = por %p2761_p5, %p2760_p12 }
  0xb3   : > { %p2763_p4 = pnand %p2762_p7, %p2756_p9 }
  0xb5   : > { %2766 = shalt.err (!%p2763_p4)
}
  0xb6   : > { %s2767_s10 = scalar_lea.vmem %s408_s13, 128  ;;  %s2873_s22 = smov [#allocation5]  }
  0xb7   : > { %p2768_p1 = scmp.ne.s32.totalorder %s408_s13, %s2767_s10  ;;  %s2772_s11 = sshll.u32 %s2873_s22, 4  ;;  %s2773_s11 = int_to_ptr.vmem [resolvable:$false] %s2772_s11 }
  0xb8   : > { %s2774_s2 = scalar_lea.vmem %s2773_s11, 256  ;;  %p2775_p0 = scmp.lt.s32.totalorder %s408_s13, %s2773_s11 }
  0xb9   : > { %p2770_p3 = pnand %p2768_p1, %p2724_p8  ;;  %p2776_p6 = scmp.lt.s32.totalorder %s2774_s2, %s2767_s10 }
  0xbb   : > { %p2771_p13 = pneg %p2770_p3  ;;  %p2777_p10 = por %p2776_p6, %p2775_p0 }
  0xbd   : > { %p2778_p11 = pnand %p2777_p10, %p2771_p13 }
  0xbf   : > { %2781 = shalt.err (!%p2778_p11)
}
  0xc0   : > { %2406 = dma.hbm_to_vmem [thread:$0]  (!%p3125_p2), %s3132_s28, 128, %s408_s13, %s397_s14  }
  0xc1   : > { %p3592_p9 = scmp.ne.s32.totalorder %s3577_s24, 0 }
  0xc2   : > { %s3185_s30 = sand.u32 (!%p3592_p9), 1, %s2856_s18   ;;  %p3593_p8 = scmp.ne.s32.totalorder (!%p3592_p9), %s3588_s15, 0 }
  0xc3   : > { %416 = sbr.rel (%p3592_p9) target bundleno = 6743 (0x1a57), region = 64  ;;  %s2072_s19 = sshll.u32 (!%p3592_p9), %s3185_s30, 3 }
  0xc4   : > { %s419_s12 = scalar_lea.sflag (!%p3592_p9), [#allocation3], %s3185_s30  ;;  %s422_s9 = scalar_lea.vmem (!%p3592_p9), [#allocation2], %s2072_s19 }
  0xca   : > { %2827 = dma.done.wait (%p3593_p8), %s419_s12, 128  }
  0xcb   : > { %2829 = vsyncadd (%p3593_p8), %s419_s12, 4294967168  ;;  %s427_s29 = sand.u32 1, %s2965_s23   ;;  %s431_s24 = scalar_lea.vmem [#allocation5], %s2072_s19 }
  0xcc   : > { %s428_s28 = scalar_lea.sflag [#allocation6], %s427_s29 }
  0xcd   : > { %2831 = dma.done.wait (%p3593_p8), %s428_s28, 128  }
  0xce   : > { %2833 = vsyncadd (%p3593_p8), %s428_s28, 4294967168  ;;  %p3594_p6 = scmp.eq.s32.totalorder %s2965_s23, 0 }
  0xd0   : > { %2835 = dma.done.wait (%p3594_p6), [#allocation6], 64   ;;  %p3595_p2 = pmov %p3594_p6 }
  0xd2   : > { %2837 = vsyncadd (%p3595_p2), [#allocation6], 4294967232  ;;  %p3596_p12 = pmov %p3595_p2 }
  0xd3   : > { %p3597_p5 = pmov %p3595_p2 }
  0xd4   : > { %2839 = dma.done.wait (%p3596_p12), [#allocation9], 1552  }
  0xd5   : > { %2841 = vsyncadd (%p3597_p5), [#allocation9], 4294965744  ;;  %p3598_p7 = pmov %p3595_p2 }
  0xd6   : > { %p3599_p4 = pmov %p3595_p2 }
  0xd7   : > { %2843 = dma.done.wait (%p3598_p7), [#allocation12], 16  }
  0xd8   : > { %2845 = vsyncadd (%p3599_p4), [#allocation12], 4294967280  ;;  %v493_v0 = vlaneseq  ;;  %v3216_v6 = vld [vmem:[%s422_s9] sm:$0xff]  ;;  %v3218_v7 = vld [vmem:[%s431_s24] sm:$0xff]  ;;  %vm504_vm0 = vcmask 261120   ;;  %v2874_v21 = vmov 0  }
  0xd9   : > { %v492_v8 = vld [vmem:[#allocation7] sm:$0xf]  ;;  %2468 = vset.pattern.permute.xlu1 %v2874_v21  ;;  %2469 = vset.pattern.permute.xlu0 %v2874_v21  ;;  %v2875_v22 = vmov 0.0|0.0   ;;  %v555_v39 = vld [vmem:[%s3557_s6 + $0x8] sm:$0xff]  ;;  %v556_v42 = vld [vmem:[%s3557_s6 + $0x10] sm:$0xff]  ;;  %vm2876_vm1 = vmmov 0  }
  0xda   : > { %v3210_v1 = vshrl.u32 %v493_v0, 7  ;;  %2293 = vmatprep.subr.bf16.mxu0 %v2875_v22  ;;  %2311 = vmatprep.subr.bf16.mxu1 %v2875_v22  ;;  %v522_v23 = vld [vmem:[%s3554_s3] sm:$0xff]  ;;  %v557_v43 = vld [vmem:[%s3557_s6 + $0x18] sm:$0xff]  ;;  %v639_v47 = vld [vmem:[%s3558_s7 + $0x8] sm:$0xff]  ;;  %v2877_v49 = vmov 0.0   ;;  %s2878_s16 = smov 96  }
  0xdb   : > { %v524_v24 = vld [vmem:[%s3555_s4] sm:$0xff]  ;;  %v2297_v44 = vpack.c.bf16 %v557_v43, %v556_v42  ;;  %2175 = vmatprep.mubr.msk.f32.mxu0 %vm2876_vm1, %v2877_v49  ;;  %2208 = vmatprep.mubr.msk.f32.mxu1 %vm2876_vm1, %v2877_v49  ;;  %v640_v50 = vld [vmem:[%s3558_s7 + $0x10] sm:$0xff]  ;;  %v641_v51 = vld [vmem:[%s3558_s7 + $0x18] sm:$0xff]  ;;  %s2879_s8 = smov 16   ;;  %s2880_s10 = smov 32   ;;  %vm776_vm2 = vcmask 130048  }
  0xdc   : > { %v495_v2 = vsub.s32 0, %v3210_v1  ;;  %v500_v3 = vsub.s32 1, %v3210_v1  ;;  %v510_v4 = vsub.s32 2, %v3210_v1  ;;  %v515_v5 = vsub.s32 3, %v3210_v1  ;;  %v533_v28 = vld [vmem:[%s3556_s5] sm:$0xff]  ;;  %s2881_s22 = smov 80  }
  0xdd   : > { %v554_v38 = vld [vmem:[%s3557_s6] sm:$0xff]  ;;  %v3273_v52 = vpack.c.bf16 %v641_v51, %v640_v50  ;;  %vm1728_vm3 = vcmask 1040384   ;;  %vm1730_vm4 = vcmask 1041408   ;;  %vm1732_vm5 = vcmask 1042432   ;;  %s2882_s11 = smov 64   ;;  %s2106_s2 = sshll.u32 %s2965_s23, 4 }
  0xde   : > { %v496_v9 = vrot.slane %v492_v8, %v495_v2  ;;  %v501_v10 = vrot.slane %v492_v8, %v500_v3  ;;  %v511_v11 = vrot.slane %v492_v8, %v510_v4  ;;  %v516_v12 = vrot.slane %v492_v8, %v515_v5  ;;  %v638_v46 = vld [vmem:[%s3558_s7] sm:$0xff]  ;;  %s489_s19 = scalar_lea.vmem [#allocation13], %s3185_s30  ;;  %s3600_s28 = sld [smem:[#allocation27_spill]] }
  0xdf   : > { %v2294_v40 = vpack.c.bf16 %v555_v39, %v554_v38  ;;  %v3259_v48 = vpack.c.bf16 %v639_v47, %v638_v46  ;;  %v2080_v58 = vld [vmem:[#allocation8] ss:$0 sm:$0xff]  ;;  %vm1734_vm6 = vcmask 1043456   ;;  %vm1736_vm7 = vcmask 1044480   ;;  %s1933_s12 = sshll.u32 %s489_s19, 4  ;;  %s1921_s15 = scalar_lea.sflag [#allocation4], %s3185_s30  ;;  %s3509_s12 = int_to_ptr.vmem [resolvable:$true] %s1933_s12 }
  0xe0   : > { %v497_v13 = vmul.f32 %v496_v9, %v3216_v6  ;;  %v502_v14 = vmul.f32 %v501_v10, %v3218_v7  ;;  %v512_v15 = vmul.f32 %v511_v11, %v3216_v6  ;;  %v517_v16 = vmul.f32 %v516_v12, %v3218_v7  ;;  %s2782_s13 = scalar_lea.vmem %s3509_s12, 16  ;;  %p3601_p3 = scmp.ne.s32.totalorder %s3589_s25, 0 }
  0xe1   : > { %2295 = vmatpush3.bf16.msra.mxu0 %v2294_v40  ;;  %2313 = vmatpush3.bf16.msra.mxu1 %v3259_v48  ;;  %vm1738_vm8 = vcmask 1045504   ;;  %vm1740_vm9 = vcmask 1046528   ;;  %vm1830_vm10 = vcmask 523264   ;;  %vm1845_vm11 = vcmask 785408   ;;  %p2783_p1 = scmp.ne.s32.totalorder %s3509_s12, %s2782_s13  ;;  %s2883_s23 = smov [#allocation13]  }
  0xe2   : > { %v503_v17 = vadd.f32 %v502_v14, %v497_v13  ;;  %v518_v18 = vadd.f32 %v517_v16, %v512_v15  ;;  %2296 = vmatprep.subr.bf16.mxu0 %v2875_v22  ;;  %2314 = vmatprep.subr.bf16.mxu1 %v2875_v22  ;;  %s2786_s14 = sshll.u32 %s2883_s23, 4  ;;  %s2787_s14 = int_to_ptr.vmem [resolvable:$false] %s2786_s14 }
  0xe3   : > { %p2784_p13 = pnand %p2783_p1, %p3601_p3  ;;  %s2788_s21 = scalar_lea.vmem %s2787_s14, 32 }
  0xe4   : > { %v505_v19 = vsel %vm504_vm0, %v503_v17, 0.0  ;;  %v519_v20 = vsel %vm504_vm0, %v518_v18, 0.0  ;;  %s3507_s24 = scalar_lea.hbm %s3600_s28, %s2106_s2  ;;  %p2789_p10 = scmp.lt.s32.totalorder %s3509_s12, %s2787_s14 }
  0xe5   : > { %506 = vadd.xlane.f32.xlu0 %v505_v19  ;;  %2298 = vmatpush3.bf16.msra.mxu0 %v2297_v44  ;;  %p2785_p0 = pneg %p2784_p13  ;;  %p2790_p11 = scmp.lt.s32.totalorder %s2788_s21, %s2782_s13 }
  0xe6   : > { %2299 = vmatprep.subr.bf16.mxu0 %v2875_v22  ;;  %2316 = vmatpush3.bf16.msra.mxu1 %v3273_v52 }
  0xe7   : > { %2323 = vmatprep.subr.bf16.mxu1 %v2875_v22  ;;  %p2791_p9 = por %p2790_p11, %p2789_p10 }
  0xe9   : > { %520 = vadd.xlane.f32.xlu0 %v519_v20  ;;  %p2792_p8 = pnand %p2791_p9, %p2785_p0 }
 0x172   : > { %v507_v25 = vpop.xlane.xlu0 %506 }
 0x173   : > { %v523_v26 = vmul.f32 %v522_v23, %v507_v25 }
 0x175   : > { %v525_v27 = vadd.f32 %v524_v24, %v523_v26 }
 0x176   : > { %v521_v29 = vpop.xlane.xlu0 %520 }
 0x177   : > { %v2078_v30 = vmul.f32 -1.442695, %v525_v27  ;;  %v532_v31 = vmul.f32 %v522_v23, %v521_v29 }
 0x179   : > { %2470 = vpow2.f32 %v2078_v30  ;;  %v534_v32 = vadd.f32 %v533_v28, %v532_v31 }
 0x17b   : > { %v2079_v33 = vmul.f32 -1.442695, %v534_v32 }
 0x17d   : > { %2472 = vpow2.f32 %v2079_v33 }
 0x183   : > { %v2471_v34 = vpop.eup %2470 }
 0x184   : > { %v529_v35 = vadd.f32 1.0, %v2471_v34 }
 0x186   : > { %2474 = vrcp.f32 %v529_v35 }
 0x187   : > { %v2473_v36 = vpop.eup %2472 }
 0x188   : > { %v538_v37 = vadd.f32 1.0, %v2473_v36 }
 0x18a   : > { %2476 = vrcp.f32 %v538_v37 }
 0x190   : > { %v2475_v41 = vpop.eup %2474 }
 0x191   : > { %543 = vperm.xlu1 %2468, %v2475_v41  }
 0x194   : > { %v2477_v45 = vpop.eup %2476 }
 0x195   : > { %549 = vperm.xlu1 %2468, %v2477_v45  }
 0x210   : > { %v544_v53 = vpop.permute.xlu1 %543 }
 0x211   : > { %v546_v55 = vmul.f32 %v544_v53, %v3216_v6 }
 0x214   : > { %v550_v54 = vpop.permute.xlu1 %549 }
 0x215   : > { %v552_v56 = vmul.f32 %v550_v54, %v3218_v7 }
 0x217   : > { %v553_v57 = vadd.f32 %v552_v56, %v546_v55 }
 0x219   : > { %2176 = vmatmul.mubr.msk.f32.vlgmr.msra.gmra.mrb[0].mxu0 %vm504_vm0, %v553_v57 }
 0x21a   : > { %2301 = vmatpush3.bf16.msra.mxu0 %v3259_v48  ;;  %2186 = vmatprep.mubr.msk.f32.mxu0 %vm2876_vm1, %v2877_v49 }
 0x21b   : > { %2302 = vmatprep.subr.bf16.mxu0 %v2875_v22 }
 0x21e   : > { %2304 = vmatpush3.bf16.msra.mxu0 %v3273_v52 }
 0x21f   : > { %2305 = vmatprep.subr.bf16.mxu0 %v2875_v22 }
 0x221   : > { %2187 = vmatmul.mubr.f32.vlgmr.msra.gmra.mrb[2].mxu0 %v2877_v49 }
 0x222   : > { %2307 = vmatpush3.bf16.msra.mxu0 %v3259_v48  ;;  %2197 = vmatprep.mubr.msk.f32.mxu0 %vm2876_vm1, %v2877_v49 }
 0x223   : > { %2308 = vmatprep.subr.bf16.mxu0 %v2875_v22 }
 0x226   : > { %2310 = vmatpush3.bf16.msra.mxu0 %v3273_v52 }
 0x227   : > { %2317 = vmatprep.subr.bf16.mxu0 %v2875_v22 }
 0x2ec   : > { %v634_v59 = vpop.f32.mrb[0].mxu0 }
 0x2ed   : > { %v2177_v60 = vpop.f32.mrb[1].mxu0  ;;  %v3293_v61 = vadd.f32 %v2080_v58, %v634_v59 }
 0x2ef   : > { %v717_v62 = vrot.slane %v3293_v61, 7  ;;  %v851_v35 = vrot.slane %v3293_v61, 1  ;;  %v854_v36 = vrot.slane %v3293_v61, 6 }
 0x2f4   : > { %v711_v63 = vpop.f32.mrb[2].mxu0 }
 0x2f5   : > { %v715_v0 = vadd.f32 %v711_v63, %v3293_v61  ;;  %v719_v3 = vadd.f32 %v717_v62, %v711_v63  ;;  %v2188_v4 = vpop.f32.mrb[3].mxu0 }
 0x2f7   : > { %2478 = vtanh.f32 %v715_v0  ;;  %v2082_v7 = vmul.f32 -1.442695, %v715_v0  ;;  %v2083_v8 = vmul.f32 -1.442695, %v719_v3 }
 0x2f8   : > { %2480 = vtanh.f32 %v719_v3 }
 0x2f9   : > { %2482 = vpow2.f32 %v2082_v7 }
 0x2fa   : > { %2484 = vpow2.f32 %v2083_v8 }
 0x301   : > { %v2479_v5 = vpop.eup %2478 }
 0x302   : > { %v2481_v6 = vpop.eup %2480  ;;  %736 = vrot.lane.b32.xlu0 %v2479_v5, %s2878_s16 }
 0x303   : > { %747 = vrot.lane.b32.xlu1 %v2481_v6, %s2878_s16  ;;  %v2483_v9 = vpop.eup %2482 }
 0x304   : > { %v723_v10 = vadd.f32 1.0, %v2483_v9  ;;  %v2485_v11 = vpop.eup %2484 }
 0x305   : > { %v730_v12 = vadd.f32 1.0, %v2485_v11 }
 0x306   : > { %2486 = vrcp.f32 %v723_v10 }
 0x307   : > { %2488 = vrcp.f32 %v730_v12 }
 0x310   : > { %v2487_v13 = vpop.eup %2486 }
 0x311   : > { %v2489_v17 = vpop.eup %2488  ;;  %v734_v19 = vmul.f32 0.0, %v2487_v13 }
 0x312   : > { %v745_v23 = vmul.f32 0.0, %v2489_v17 }
 0x374   : > { %v737_v14 = vpop.permute.xlu0 %736 }
 0x375   : > { %v739_v15 = vmul.f32 %v2487_v13, %v737_v14  ;;  %v748_v16 = vpop.permute.xlu1 %747  ;;  %v990_v14 = vrot.slane %v3293_v61, 5 }
 0x376   : > { %v750_v18 = vmul.f32 %v2489_v17, %v748_v16 }
 0x377   : > { %741 = vrot.lane.b32.xlu1 %v739_v15, %s2879_s8 }
 0x37b   : > { %752 = vrot.lane.b32.xlu1 %v750_v18, %s2879_s8 }
 0x3e9   : > { %v742_v20 = vpop.permute.xlu1 %741 }
 0x3ea   : > { %v744_v21 = vadd.f32 %v742_v20, %v734_v19 }
 0x3ec   : > { %2490 = vtanh.f32 %v744_v21 }
 0x3ed   : > { %v753_v24 = vpop.permute.xlu1 %752 }
 0x3ee   : > { %v755_v25 = vadd.f32 %v753_v24, %v745_v23 }
 0x3f0   : > { %2492 = vtanh.f32 %v755_v25 }
 0x3f6   : > { %v2491_v26 = vpop.eup %2490 }
 0x3f7   : > { %758 = vrot.lane.b32.xlu1 %v2491_v26, %s2880_s10 }
 0x3fa   : > { %v2493_v27 = vpop.eup %2492 }
 0x3fb   : > { %764 = vrot.lane.b32.xlu1 %v2493_v27, %s2880_s10 }
 0x469   : > { %v759_v28 = vpop.permute.xlu1 %758 }
 0x46a   : > { %v3305_v29 = vmul.f32 %v2487_v13, %v759_v28  ;;  %v987_v13 = vrot.slane %v3293_v61, 2 }
 0x46c   : > { %769 = vrot.lane.b32.xlu1 %v3305_v29, %s2881_s22 }
 0x46d   : > { %v765_v30 = vpop.permute.xlu1 %764 }
 0x46e   : > { %v3309_v31 = vmul.f32 %v2489_v17, %v765_v30 }
 0x470   : > { %773 = vrot.lane.b32.xlu0 %v3309_v31, %s2880_s10 }
 0x4de   : > { %v770_v32 = vpop.permute.xlu1 %769 }
 0x4e2   : > { %v774_v33 = vpop.permute.xlu0 %773 }
 0x4e3   : > { %v777_v34 = vsel %vm776_vm2, %v770_v32, %v774_v33 }
 0x4e4   : > { %2198 = vmatmul.mubr.msk.f32.vlgmr.msra.gmra.mrb[4].mxu0 %vm504_vm0, %v777_v34 }
 0x4e5   : > { %2319 = vmatpush3.bf16.msra.mxu0 %v3259_v48  ;;  %2219 = vmatprep.mubr.msk.f32.mxu0 %vm2876_vm1, %v2877_v49 }
 0x4e6   : > { %2320 = vmatprep.subr.bf16.mxu0 %v2875_v22 }
 0x4e9   : > { %2322 = vmatpush3.bf16.msra.mxu0 %v3273_v52 }
 0x4ea   : > { %2329 = vmatprep.subr.bf16.mxu0 %v2875_v22 }
 0x5b7   : > { %v847_v37 = vpop.f32.mrb[4].mxu0 }
 0x5b8   : > { %v853_v38 = vadd.f32 %v851_v35, %v847_v37  ;;  %v856_v39 = vadd.f32 %v854_v36, %v847_v37  ;;  %v2199_v40 = vpop.f32.mrb[5].mxu0 }
 0x5ba   : > { %2494 = vtanh.f32 %v853_v38  ;;  %v2085_v43 = vmul.f32 -1.442695, %v853_v38  ;;  %v2086_v44 = vmul.f32 -1.442695, %v856_v39 }
 0x5bb   : > { %2496 = vtanh.f32 %v856_v39 }
 0x5bc   : > { %2498 = vpow2.f32 %v2085_v43 }
 0x5bd   : > { %2500 = vpow2.f32 %v2086_v44 }
 0x5c4   : > { %v2495_v41 = vpop.eup %2494 }
 0x5c5   : > { %v2497_v42 = vpop.eup %2496  ;;  %873 = vrot.lane.b32.xlu1 %v2495_v41, %s2878_s16 }
 0x5c6   : > { %884 = vrot.lane.b32.xlu0 %v2497_v42, %s2878_s16  ;;  %v2499_v45 = vpop.eup %2498 }
 0x5c7   : > { %v2501_v46 = vpop.eup %2500  ;;  %v860_v47 = vadd.f32 1.0, %v2499_v45 }
 0x5c8   : > { %v867_v50 = vadd.f32 1.0, %v2501_v46 }
 0x5c9   : > { %2502 = vrcp.f32 %v860_v47 }
 0x5ca   : > { %2504 = vrcp.f32 %v867_v50 }
 0x5d3   : > { %v2503_v51 = vpop.eup %2502 }
 0x5d4   : > { %v2505_v54 = vpop.eup %2504  ;;  %v871_v58 = vmul.f32 %v2503_v51, %v744_v21 }
 0x5d5   : > { %v882_v59 = vmul.f32 %v2505_v54, %v755_v25 }
 0x637   : > { %v874_v53 = vpop.permute.xlu1 %873 }
 0x638   : > { %v885_v55 = vpop.permute.xlu0 %884  ;;  %v876_v56 = vmul.f32 %v2503_v51, %v874_v53 }
 0x639   : > { %v887_v57 = vmul.f32 %v2505_v54, %v885_v55 }
 0x63a   : > { %878 = vrot.lane.b32.xlu1 %v876_v56, %s2879_s8 }
 0x63b   : > { %889 = vrot.lane.b32.xlu0 %v887_v57, %s2879_s8 }
 0x6ac   : > { %v879_v60 = vpop.permute.xlu1 %878 }
 0x6ad   : > { %v890_v63 = vpop.permute.xlu0 %889  ;;  %v881_v0 = vadd.f32 %v879_v60, %v871_v58  ;;  %v1126_v60 = vrot.slane %v3293_v61, 4 }
 0x6ae   : > { %v892_v3 = vadd.f32 %v890_v63, %v882_v59 }
 0x6af   : > { %2506 = vtanh.f32 %v881_v0 }
 0x6b0   : > { %2508 = vtanh.f32 %v892_v3 }
 0x6b9   : > { %v2507_v4 = vpop.eup %2506 }
 0x6ba   : > { %v2509_v5 = vpop.eup %2508  ;;  %895 = vrot.lane.b32.xlu1 %v2507_v4, %s2880_s10 }
 0x6bb   : > { %901 = vrot.lane.b32.xlu0 %v2509_v5, %s2880_s10 }
 0x72c   : > { %v896_v6 = vpop.permute.xlu1 %895 }
 0x72d   : > { %v902_v7 = vpop.permute.xlu0 %901  ;;  %v3333_v8 = vmul.f32 %v2503_v51, %v896_v6 }
 0x72e   : > { %v3335_v9 = vmul.f32 %v2505_v54, %v902_v7 }
 0x72f   : > { %906 = vrot.lane.b32.xlu1 %v3333_v8, %s2881_s22  ;;  %v1714_v46 = vrot.slane %v3333_v8, 7 }
 0x730   : > { %910 = vrot.lane.b32.xlu0 %v3335_v9, %s2880_s10 }
 0x731   : > { %v1729_v55 = vsel %vm1728_vm3, %v3305_v29, %v1714_v46  ;;  %v1123_v29 = vrot.slane %v3293_v61, 3 }
 0x7a1   : > { %v907_v10 = vpop.permute.xlu1 %906 }
 0x7a2   : > { %v911_v11 = vpop.permute.xlu0 %910 }
 0x7a3   : > { %v913_v12 = vsel %vm776_vm2, %v907_v10, %v911_v11 }
 0x7a4   : > { %2209 = vmatmul.mubr.msk.f32.vlgmr.msra.gmra.mrb[0].mxu1 %vm504_vm0, %v913_v12 }
 0x7a5   : > { %2325 = vmatpush3.bf16.msra.mxu1 %v3259_v48  ;;  %2230 = vmatprep.mubr.msk.f32.mxu1 %vm2876_vm1, %v2877_v49 }
 0x7a6   : > { %2326 = vmatprep.subr.bf16.mxu1 %v2875_v22 }
 0x7a9   : > { %2328 = vmatpush3.bf16.msra.mxu1 %v3273_v52 }
 0x7aa   : > { %2335 = vmatprep.subr.bf16.mxu1 %v2875_v22 }
 0x877   : > { %v983_v15 = vpop.f32.mrb[0].mxu1 }
 0x878   : > { %v989_v16 = vadd.f32 %v987_v13, %v983_v15  ;;  %v992_v17 = vadd.f32 %v990_v14, %v983_v15  ;;  %v2210_v18 = vpop.f32.mrb[1].mxu1 }
 0x87a   : > { %2510 = vtanh.f32 %v989_v16  ;;  %v2088_v21 = vmul.f32 -1.442695, %v989_v16  ;;  %v2089_v23 = vmul.f32 -1.442695, %v992_v17 }
 0x87b   : > { %2512 = vtanh.f32 %v992_v17 }
 0x87c   : > { %2514 = vpow2.f32 %v2088_v21 }
 0x87d   : > { %2516 = vpow2.f32 %v2089_v23 }
 0x884   : > { %v2511_v19 = vpop.eup %2510 }
 0x885   : > { %v2513_v20 = vpop.eup %2512  ;;  %1009 = vrot.lane.b32.xlu1 %v2511_v19, %s2878_s16 }
 0x886   : > { %1020 = vrot.lane.b32.xlu0 %v2513_v20, %s2878_s16  ;;  %v2515_v24 = vpop.eup %2514 }
 0x887   : > { %v2517_v25 = vpop.eup %2516  ;;  %v996_v26 = vadd.f32 1.0, %v2515_v24 }
 0x888   : > { %v1003_v27 = vadd.f32 1.0, %v2517_v25 }
 0x889   : > { %2518 = vrcp.f32 %v996_v26 }
 0x88a   : > { %2520 = vrcp.f32 %v1003_v27 }
 0x893   : > { %v2519_v28 = vpop.eup %2518 }
 0x894   : > { %v2521_v32 = vpop.eup %2520  ;;  %v1007_v38 = vmul.f32 %v2519_v28, %v881_v0 }
 0x895   : > { %v1018_v39 = vmul.f32 %v2521_v32, %v892_v3 }
 0x8f7   : > { %v1010_v30 = vpop.permute.xlu1 %1009 }
 0x8f8   : > { %v1021_v33 = vpop.permute.xlu0 %1020  ;;  %v1012_v34 = vmul.f32 %v2519_v28, %v1010_v30 }
 0x8f9   : > { %v1023_v37 = vmul.f32 %v2521_v32, %v1021_v33 }
 0x8fa   : > { %1014 = vrot.lane.b32.xlu1 %v1012_v34, %s2879_s8 }
 0x8fb   : > { %1025 = vrot.lane.b32.xlu0 %v1023_v37, %s2879_s8 }
 0x96c   : > { %v1015_v40 = vpop.permute.xlu1 %1014 }
 0x96d   : > { %v1026_v41 = vpop.permute.xlu0 %1025  ;;  %v1017_v42 = vadd.f32 %v1015_v40, %v1007_v38 }
 0x96e   : > { %v1028_v43 = vadd.f32 %v1026_v41, %v1018_v39 }
 0x96f   : > { %2522 = vtanh.f32 %v1017_v42 }
 0x970   : > { %2524 = vtanh.f32 %v1028_v43 }
 0x979   : > { %v2523_v44 = vpop.eup %2522 }
 0x97a   : > { %v2525_v45 = vpop.eup %2524  ;;  %1031 = vrot.lane.b32.xlu1 %v2523_v44, %s2880_s10 }
 0x97b   : > { %1037 = vrot.lane.b32.xlu0 %v2525_v45, %s2880_s10 }
 0x9ec   : > { %v1032_v47 = vpop.permute.xlu1 %1031 }
 0x9ed   : > { %v1038_v50 = vpop.permute.xlu0 %1037  ;;  %v1034_v51 = vmul.f32 %v2519_v28, %v1032_v47 }
 0x9ee   : > { %v3362_v53 = vmul.f32 %v2521_v32, %v1038_v50 }
 0x9ef   : > { %v1716_v54 = vrot.slane %v1034_v51, 6  ;;  %1042 = vrot.lane.b32.xlu1 %v1034_v51, %s2881_s22 }
 0x9f0   : > { %1046 = vrot.lane.b32.xlu0 %v3362_v53, %s2880_s10 }
 0x9f1   : > { %v1731_v56 = vsel %vm1730_vm4, %v1729_v55, %v1716_v54 }
 0xa61   : > { %v1043_v57 = vpop.permute.xlu1 %1042 }
 0xa62   : > { %v1047_v58 = vpop.permute.xlu0 %1046 }
 0xa63   : > { %v1049_v59 = vsel %vm776_vm2, %v1043_v57, %v1047_v58 }
 0xa64   : > { %2220 = vmatmul.mubr.msk.f32.vlgmr.msra.gmra.mrb[6].mxu0 %vm504_vm0, %v1049_v59 }
 0xa65   : > { %2331 = vmatpush3.bf16.msra.mxu0 %v3259_v48  ;;  %2241 = vmatprep.mubr.msk.f32.mxu0 %vm2876_vm1, %v2877_v49 }
 0xa66   : > { %2332 = vmatprep.subr.bf16.mxu0 %v2875_v22 }
 0xa69   : > { %2334 = vmatpush3.bf16.msra.mxu0 %v3273_v52 }
 0xa6a   : > { %2341 = vmatprep.subr.bf16.mxu0 %v2875_v22 }
 0xb37   : > { %v1119_v63 = vpop.f32.mrb[6].mxu0 }
 0xb38   : > { %v1125_v0 = vadd.f32 %v1123_v29, %v1119_v63  ;;  %v1128_v3 = vadd.f32 %v1126_v60, %v1119_v63  ;;  %v2221_v4 = vpop.f32.mrb[7].mxu0 }
 0xb3a   : > { %2526 = vtanh.f32 %v1125_v0  ;;  %v2091_v7 = vmul.f32 -1.442695, %v1125_v0  ;;  %v2092_v8 = vmul.f32 -1.442695, %v1128_v3 }
 0xb3b   : > { %2528 = vtanh.f32 %v1128_v3 }
 0xb3c   : > { %2530 = vpow2.f32 %v2091_v7 }
 0xb3d   : > { %2532 = vpow2.f32 %v2092_v8 }
 0xb44   : > { %v2527_v5 = vpop.eup %2526 }
 0xb45   : > { %v2529_v6 = vpop.eup %2528  ;;  %1145 = vrot.lane.b32.xlu1 %v2527_v5, %s2878_s16 }
 0xb46   : > { %1156 = vrot.lane.b32.xlu0 %v2529_v6, %s2878_s16  ;;  %v2531_v10 = vpop.eup %2530 }
 0xb47   : > { %v2533_v11 = vpop.eup %2532  ;;  %v1132_v12 = vadd.f32 1.0, %v2531_v10 }
 0xb48   : > { %v1139_v15 = vadd.f32 1.0, %v2533_v11 }
 0xb49   : > { %2534 = vrcp.f32 %v1132_v12 }
 0xb4a   : > { %2536 = vrcp.f32 %v1139_v15 }
 0xb53   : > { %v2535_v16 = vpop.eup %2534 }
 0xb54   : > { %v2537_v18 = vpop.eup %2536  ;;  %v1143_v23 = vmul.f32 %v2535_v16, %v1017_v42 }
 0xb55   : > { %v1154_v24 = vmul.f32 %v2537_v18, %v1028_v43 }
 0xbb7   : > { %v1146_v17 = vpop.permute.xlu1 %1145 }
 0xbb8   : > { %v1157_v19 = vpop.permute.xlu0 %1156  ;;  %v1148_v20 = vmul.f32 %v2535_v16, %v1146_v17 }
 0xbb9   : > { %v1159_v21 = vmul.f32 %v2537_v18, %v1157_v19 }
 0xbba   : > { %1150 = vrot.lane.b32.xlu1 %v1148_v20, %s2879_s8 }
 0xbbb   : > { %1161 = vrot.lane.b32.xlu0 %v1159_v21, %s2879_s8 }
 0xc2c   : > { %v1151_v25 = vpop.permute.xlu1 %1150 }
 0xc2d   : > { %v1162_v26 = vpop.permute.xlu0 %1161  ;;  %v1153_v27 = vadd.f32 %v1151_v25, %v1143_v23 }
 0xc2e   : > { %v1164_v28 = vadd.f32 %v1162_v26, %v1154_v24 }
 0xc2f   : > { %2538 = vtanh.f32 %v1153_v27 }
 0xc30   : > { %2540 = vtanh.f32 %v1164_v28 }
 0xc39   : > { %v2539_v30 = vpop.eup %2538 }
 0xc3a   : > { %v2541_v32 = vpop.eup %2540  ;;  %1167 = vrot.lane.b32.xlu1 %v2539_v30, %s2880_s10 }
 0xc3b   : > { %1173 = vrot.lane.b32.xlu0 %v2541_v32, %s2880_s10 }
 0xcac   : > { %v1168_v33 = vpop.permute.xlu1 %1167 }
 0xcad   : > { %v1174_v34 = vpop.permute.xlu0 %1173  ;;  %v1170_v37 = vmul.f32 %v2535_v16, %v1168_v33 }
 0xcae   : > { %v3386_v38 = vmul.f32 %v2537_v18, %v1174_v34 }
 0xcaf   : > { %v1718_v39 = vrot.slane %v1170_v37, 5  ;;  %1178 = vrot.lane.b32.xlu1 %v1170_v37, %s2881_s22 }
 0xcb0   : > { %1182 = vrot.lane.b32.xlu0 %v3386_v38, %s2880_s10 }
 0xcb1   : > { %v1733_v40 = vsel %vm1732_vm5, %v1731_v56, %v1718_v39 }
 0xd21   : > { %v1179_v41 = vpop.permute.xlu1 %1178 }
 0xd22   : > { %v1183_v42 = vpop.permute.xlu0 %1182 }
 0xd23   : > { %v1185_v43 = vsel %vm776_vm2, %v1179_v41, %v1183_v42 }
 0xd24   : > { %2231 = vmatmul.mubr.msk.f32.vlgmr.msra.gmra.mrb[2].mxu1 %vm504_vm0, %v1185_v43 }
 0xd25   : > { %2337 = vmatpush3.bf16.msra.mxu1 %v3259_v48  ;;  %2252 = vmatprep.mubr.msk.f32.mxu1 %vm2876_vm1, %v2877_v49 }
 0xd26   : > { %2338 = vmatprep.subr.bf16.mxu1 %v2875_v22 }
 0xd29   : > { %2340 = vmatpush3.bf16.msra.mxu1 %v3273_v52 }
 0xd2a   : > { %2347 = vmatprep.subr.bf16.mxu1 %v2875_v22 }
 0xdf7   : > { %v1255_v44 = vpop.f32.mrb[2].mxu1 }
 0xdf8   : > { %v1259_v45 = vadd.f32 %v1255_v44, %v1126_v60  ;;  %v1260_v46 = vadd.f32 %v1255_v44, %v1123_v29  ;;  %v2232_v47 = vpop.f32.mrb[3].mxu1 }
 0xdfa   : > { %2542 = vtanh.f32 %v1259_v45  ;;  %v2094_v54 = vmul.f32 -1.442695, %v1259_v45  ;;  %v2095_v55 = vmul.f32 -1.442695, %v1260_v46 }
 0xdfb   : > { %2544 = vtanh.f32 %v1260_v46 }
 0xdfc   : > { %2546 = vpow2.f32 %v2094_v54 }
 0xdfd   : > { %2548 = vpow2.f32 %v2095_v55 }
 0xe04   : > { %v2543_v50 = vpop.eup %2542 }
 0xe05   : > { %v2545_v51 = vpop.eup %2544  ;;  %1277 = vrot.lane.b32.xlu1 %v2543_v50, %s2878_s16 }
 0xe06   : > { %1288 = vrot.lane.b32.xlu0 %v2545_v51, %s2878_s16  ;;  %v2547_v56 = vpop.eup %2546 }
 0xe07   : > { %v2549_v57 = vpop.eup %2548  ;;  %v1264_v58 = vadd.f32 1.0, %v2547_v56 }
 0xe08   : > { %v1271_v59 = vadd.f32 1.0, %v2549_v57 }
 0xe09   : > { %2550 = vrcp.f32 %v1264_v58 }
 0xe0a   : > { %2552 = vrcp.f32 %v1271_v59 }
 0xe13   : > { %v2551_v29 = vpop.eup %2550 }
 0xe14   : > { %v2553_v63 = vpop.eup %2552  ;;  %v1275_v5 = vmul.f32 %v2551_v29, %v1153_v27 }
 0xe15   : > { %v1286_v6 = vmul.f32 %v2553_v63, %v1164_v28 }
 0xe77   : > { %v1278_v60 = vpop.permute.xlu1 %1277 }
 0xe78   : > { %v1289_v0 = vpop.permute.xlu0 %1288  ;;  %v1280_v3 = vmul.f32 %v2551_v29, %v1278_v60 }
 0xe79   : > { %v1291_v4 = vmul.f32 %v2553_v63, %v1289_v0 }
 0xe7a   : > { %1282 = vrot.lane.b32.xlu1 %v1280_v3, %s2879_s8 }
 0xe7b   : > { %1293 = vrot.lane.b32.xlu0 %v1291_v4, %s2879_s8 }
 0xeec   : > { %v1283_v7 = vpop.permute.xlu1 %1282 }
 0xeed   : > { %v1294_v8 = vpop.permute.xlu0 %1293  ;;  %v1285_v10 = vadd.f32 %v1283_v7, %v1275_v5 }
 0xeee   : > { %v1296_v11 = vadd.f32 %v1294_v8, %v1286_v6 }
 0xeef   : > { %2554 = vtanh.f32 %v1285_v10 }
 0xef0   : > { %2556 = vtanh.f32 %v1296_v11 }
 0xef9   : > { %v2555_v12 = vpop.eup %2554 }
 0xefa   : > { %v2557_v15 = vpop.eup %2556  ;;  %1299 = vrot.lane.b32.xlu1 %v2555_v12, %s2880_s10 }
 0xefb   : > { %1305 = vrot.lane.b32.xlu0 %v2557_v15, %s2880_s10 }
 0xf6c   : > { %v1300_v16 = vpop.permute.xlu1 %1299 }
 0xf6d   : > { %v1306_v17 = vpop.permute.xlu0 %1305  ;;  %v1302_v18 = vmul.f32 %v2551_v29, %v1300_v16 }
 0xf6e   : > { %v3406_v19 = vmul.f32 %v2553_v63, %v1306_v17 }
 0xf6f   : > { %v1720_v20 = vrot.slane %v1302_v18, 4  ;;  %1310 = vrot.lane.b32.xlu1 %v1302_v18, %s2881_s22 }
 0xf70   : > { %1314 = vrot.lane.b32.xlu0 %v3406_v19, %s2880_s10 }
 0xf71   : > { %v1735_v21 = vsel %vm1734_vm6, %v1733_v40, %v1720_v20 }
 0xfe1   : > { %v1311_v23 = vpop.permute.xlu1 %1310 }
 0xfe2   : > { %v1315_v24 = vpop.permute.xlu0 %1314 }
 0xfe3   : > { %v1317_v25 = vsel %vm776_vm2, %v1311_v23, %v1315_v24 }
 0xfe4   : > { %2242 = vmatmul.mubr.msk.f32.vlgmr.msra.gmra.mrb[8].mxu0 %vm504_vm0, %v1317_v25 }
 0xfe5   : > { %2343 = vmatpush3.bf16.msra.mxu0 %v3259_v48  ;;  %2263 = vmatprep.mubr.msk.f32.mxu0 %vm2876_vm1, %v2877_v49 }
 0xfe6   : > { %2344 = vmatprep.subr.bf16.mxu0 %v2875_v22 }
 0xfe9   : > { %2346 = vmatpush3.bf16.msra.mxu0 %v3273_v52 }
0x10b7   : > { %v1387_v26 = vpop.f32.mrb[8].mxu0 }
0x10b8   : > { %v1391_v27 = vadd.f32 %v1387_v26, %v990_v14  ;;  %v1392_v28 = vadd.f32 %v1387_v26, %v987_v13  ;;  %v2243_v30 = vpop.f32.mrb[9].mxu0 }
0x10ba   : > { %2558 = vtanh.f32 %v1391_v27  ;;  %v2097_v48 = vmul.f32 -1.442695, %v1391_v27  ;;  %v2098_v34 = vmul.f32 -1.442695, %v1392_v28 }
0x10bb   : > { %2560 = vtanh.f32 %v1392_v28 }
0x10bc   : > { %2562 = vpow2.f32 %v2097_v48 }
0x10bd   : > { %2564 = vpow2.f32 %v2098_v34 }
0x10c4   : > { %v2559_v32 = vpop.eup %2558 }
0x10c5   : > { %v2561_v33 = vpop.eup %2560  ;;  %1409 = vrot.lane.b32.xlu1 %v2559_v32, %s2878_s16 }
0x10c6   : > { %1420 = vrot.lane.b32.xlu0 %v2561_v33, %s2878_s16  ;;  %v2563_v52 = vpop.eup %2562 }
0x10c7   : > { %v2565_v37 = vpop.eup %2564  ;;  %v1396_v39 = vadd.f32 1.0, %v2563_v52 }
0x10c8   : > { %v1403_v14 = vadd.f32 1.0, %v2565_v37 }
0x10c9   : > { %2566 = vrcp.f32 %v1396_v39 }
0x10ca   : > { %2568 = vrcp.f32 %v1403_v14 }
0x10d3   : > { %v2567_v13 = vpop.eup %2566 }
0x10d4   : > { %v2569_v41 = vpop.eup %2568  ;;  %v1407_v45 = vmul.f32 %v2567_v13, %v1285_v10 }
0x10d5   : > { %v1418_v46 = vmul.f32 %v2569_v41, %v1296_v11 }
0x1137   : > { %v1410_v40 = vpop.permute.xlu1 %1409 }
0x1138   : > { %v1421_v42 = vpop.permute.xlu0 %1420  ;;  %v1412_v43 = vmul.f32 %v2567_v13, %v1410_v40 }
0x1139   : > { %v1423_v44 = vmul.f32 %v2569_v41, %v1421_v42 }
0x113a   : > { %1414 = vrot.lane.b32.xlu1 %v1412_v43, %s2879_s8 }
0x113b   : > { %1425 = vrot.lane.b32.xlu0 %v1423_v44, %s2879_s8 }
0x11ac   : > { %v1415_v47 = vpop.permute.xlu1 %1414 }
0x11ad   : > { %v1426_v50 = vpop.permute.xlu0 %1425  ;;  %v1417_v51 = vadd.f32 %v1415_v47, %v1407_v45 }
0x11ae   : > { %v1428_v54 = vadd.f32 %v1426_v50, %v1418_v46 }
0x11af   : > { %2570 = vtanh.f32 %v1417_v51 }
0x11b0   : > { %2572 = vtanh.f32 %v1428_v54 }
0x11b9   : > { %v2571_v55 = vpop.eup %2570 }
0x11ba   : > { %v2573_v56 = vpop.eup %2572  ;;  %1431 = vrot.lane.b32.xlu1 %v2571_v55, %s2880_s10 }
0x11bb   : > { %1437 = vrot.lane.b32.xlu0 %v2573_v56, %s2880_s10 }
0x122c   : > { %v1432_v57 = vpop.permute.xlu1 %1431 }
0x122d   : > { %v1438_v58 = vpop.permute.xlu0 %1437  ;;  %v1434_v59 = vmul.f32 %v2567_v13, %v1432_v57 }
0x122e   : > { %v3429_v29 = vmul.f32 %v2569_v41, %v1438_v58 }
0x122f   : > { %v1722_v60 = vrot.slane %v1434_v59, 3  ;;  %1442 = vrot.lane.b32.xlu1 %v1434_v59, %s2881_s22 }
0x1230   : > { %1446 = vrot.lane.b32.xlu0 %v3429_v29, %s2880_s10 }
0x1231   : > { %v1737_v63 = vsel %vm1736_vm7, %v1735_v21, %v1722_v60 }
0x12a1   : > { %v1443_v0 = vpop.permute.xlu1 %1442 }
0x12a2   : > { %v1447_v3 = vpop.permute.xlu0 %1446 }
0x12a3   : > { %v1449_v4 = vsel %vm776_vm2, %v1443_v0, %v1447_v3 }
0x12a4   : > { %2253 = vmatmul.mubr.msk.f32.vlgmr.msra.gmra.mrb[4].mxu1 %vm504_vm0, %v1449_v4 }
0x12a5   : > { %2290 = vmatprep.mubr.msk.f32.mxu1 %vm2876_vm1, %v2877_v49 }
0x1377   : > { %v1519_v5 = vpop.f32.mrb[4].mxu1 }
0x1378   : > { %v1523_v6 = vadd.f32 %v1519_v5, %v854_v36  ;;  %v1524_v7 = vadd.f32 %v1519_v5, %v851_v35  ;;  %v2254_v8 = vpop.f32.mrb[5].mxu1 }
0x137a   : > { %2574 = vtanh.f32 %v1523_v6  ;;  %v2100_v12 = vmul.f32 -1.442695, %v1523_v6  ;;  %v2101_v15 = vmul.f32 -1.442695, %v1524_v7 }
0x137b   : > { %2576 = vtanh.f32 %v1524_v7 }
0x137c   : > { %2578 = vpow2.f32 %v2100_v12 }
0x137d   : > { %2580 = vpow2.f32 %v2101_v15 }
0x1384   : > { %v2575_v10 = vpop.eup %2574 }
0x1385   : > { %v2577_v11 = vpop.eup %2576  ;;  %1541 = vrot.lane.b32.xlu1 %v2575_v10, %s2878_s16 }
0x1386   : > { %1552 = vrot.lane.b32.xlu0 %v2577_v11, %s2878_s16  ;;  %v2579_v49 = vpop.eup %2578 }
0x1387   : > { %v2581_v16 = vpop.eup %2580  ;;  %v1528_v17 = vadd.f32 1.0, %v2579_v49 }
0x1388   : > { %v1535_v36 = vadd.f32 1.0, %v2581_v16 }
0x1389   : > { %2582 = vrcp.f32 %v1528_v17 }
0x138a   : > { %2584 = vrcp.f32 %v1535_v36  ;;  %v1744_v36 = vrot.slane %v3429_v29, 6  ;;  %v1752_v29 = vrot.slane %v3335_v9, 2 }
0x1393   : > { %v2583_v35 = vpop.eup %2582 }
0x1394   : > { %v2585_v20 = vpop.eup %2584  ;;  %v1539_v25 = vmul.f32 %v2583_v35, %v1417_v51 }
0x1395   : > { %v1550_v26 = vmul.f32 %v2585_v20, %v1428_v54 }
0x13f7   : > { %v1542_v18 = vpop.permute.xlu1 %1541 }
0x13f8   : > { %v1553_v21 = vpop.permute.xlu0 %1552  ;;  %v1544_v23 = vmul.f32 %v2583_v35, %v1542_v18  ;;  %v1746_v18 = vrot.slane %v3406_v19, 5 }
0x13f9   : > { %v1555_v24 = vmul.f32 %v2585_v20, %v1553_v21  ;;  %v1748_v21 = vrot.slane %v3386_v38, 4 }
0x13fa   : > { %1546 = vrot.lane.b32.xlu1 %v1544_v23, %s2879_s8 }
0x13fb   : > { %1557 = vrot.lane.b32.xlu0 %v1555_v24, %s2879_s8 }
0x146c   : > { %v1547_v27 = vpop.permute.xlu1 %1546 }
0x146d   : > { %v1558_v28 = vpop.permute.xlu0 %1557  ;;  %v1549_v30 = vadd.f32 %v1547_v27, %v1539_v25  ;;  %v1750_v25 = vrot.slane %v3362_v53, 3  ;;  %v1754_v27 = vrot.slane %v3309_v31, 1 }
0x146e   : > { %v1560_v32 = vadd.f32 %v1558_v28, %v1550_v26 }
0x146f   : > { %2586 = vtanh.f32 %v1549_v30 }
0x1470   : > { %2588 = vtanh.f32 %v1560_v32 }
0x1479   : > { %v2587_v33 = vpop.eup %2586 }
0x147a   : > { %v2589_v48 = vpop.eup %2588  ;;  %1563 = vrot.lane.b32.xlu1 %v2587_v33, %s2880_s10 }
0x147b   : > { %1569 = vrot.lane.b32.xlu0 %v2589_v48, %s2880_s10 }
0x14ec   : > { %v1564_v34 = vpop.permute.xlu1 %1563 }
0x14ed   : > { %v1570_v52 = vpop.permute.xlu0 %1569  ;;  %v1566_v37 = vmul.f32 %v2583_v35, %v1564_v34 }
0x14ee   : > { %v1572_v39 = vmul.f32 %v2585_v20, %v1570_v52 }
0x14ef   : > { %v1724_v14 = vrot.slane %v1566_v37, 2  ;;  %1574 = vrot.lane.b32.xlu1 %v1566_v37, %s2881_s22 }
0x14f0   : > { %1578 = vrot.lane.b32.xlu0 %v1572_v39, %s2880_s10  ;;  %v1742_v16 = vrot.slane %v1572_v39, 7 }
0x14f1   : > { %v1739_v13 = vsel %vm1738_vm8, %v1737_v63, %v1724_v14 }
0x1561   : > { %v1575_v40 = vpop.permute.xlu1 %1574 }
0x1562   : > { %v1579_v41 = vpop.permute.xlu0 %1578 }
0x1563   : > { %v1581_v42 = vsel %vm776_vm2, %v1575_v40, %v1579_v41 }
0x1564   : > { %2264 = vmatmul.mubr.msk.f32.vlgmr.msra.gmra.mrb[10].mxu0 %vm504_vm0, %v1581_v42 }
0x1637   : > { %v1651_v43 = vpop.f32.mrb[10].mxu0 }
0x1638   : > { %v1655_v44 = vadd.f32 %v1651_v43, %v717_v62  ;;  %v1656_v45 = vadd.f32 %v1651_v43, %v3293_v61  ;;  %v2265_v46 = vpop.f32.mrb[11].mxu0  ;;  %v1833_v43 = vld [vmem:[#allocation10 + $0x8] sm:$0xff] }
0x1639   : > { %v1835_v46 = vld [vmem:[#allocation10 + $0x18] sm:$0xff] }
0x163a   : > { %2590 = vtanh.f32 %v1655_v44  ;;  %v2103_v51 = vmul.f32 -1.442695, %v1655_v44  ;;  %v2104_v54 = vmul.f32 -1.442695, %v1656_v45  ;;  %v1834_v44 = vld [vmem:[#allocation10 + $0x10] sm:$0xff] }
0x163b   : > { %2592 = vtanh.f32 %v1656_v45 }
0x163c   : > { %2594 = vpow2.f32 %v2103_v51  ;;  %v1837_v51 = vld [vmem:[#allocation10 + $0x28] sm:$0xff] }
0x163d   : > { %2596 = vpow2.f32 %v2104_v54 }
0x1644   : > { %v2591_v47 = vpop.eup %2590 }
0x1645   : > { %v2593_v50 = vpop.eup %2592  ;;  %1673 = vrot.lane.b32.xlu0 %v2591_v47, %s2878_s16  ;;  %v2351_v47 = vpack.c.bf16 %v1835_v46, %v1834_v44 }
0x1646   : > { %1684 = vrot.lane.b32.xlu1 %v2593_v50, %s2878_s16  ;;  %v2595_v55 = vpop.eup %2594  ;;  %v1836_v50 = vld [vmem:[#allocation10 + $0x20] sm:$0xff] }
0x1647   : > { %v2597_v56 = vpop.eup %2596  ;;  %v1660_v57 = vadd.f32 1.0, %v2595_v55  ;;  %v2354_v54 = vpack.c.bf16 %v1837_v51, %v1836_v50  ;;  %v1838_v55 = vld [vmem:[#allocation10 + $0x30] sm:$0xff] }
0x1648   : > { %v1667_v58 = vadd.f32 1.0, %v2597_v56  ;;  %v1839_v56 = vld [vmem:[#allocation10 + $0x38] sm:$0xff] }
0x1649   : > { %2598 = vrcp.f32 %v1660_v57  ;;  %v2357_v57 = vpack.c.bf16 %v1839_v56, %v1838_v55 }
0x164a   : > { %2600 = vrcp.f32 %v1667_v58  ;;  %v1840_v58 = vld [vmem:[#allocation10 + $0x40] sm:$0xff] }
0x1653   : > { %v2599_v61 = vpop.eup %2598 }
0x1654   : > { %v2601_v59 = vpop.eup %2600  ;;  %v1671_v3 = vmul.f32 %v2599_v61, %v1549_v30 }
0x1655   : > { %v1682_v4 = vmul.f32 %v2601_v59, %v1560_v32 }
0x16b7   : > { %v1674_v62 = vpop.permute.xlu0 %1673 }
0x16b8   : > { %v1685_v60 = vpop.permute.xlu1 %1684  ;;  %v1676_v63 = vmul.f32 %v2599_v61, %v1674_v62 }
0x16b9   : > { %v1687_v0 = vmul.f32 %v2601_v59, %v1685_v60  ;;  %v1843_v60 = vld [vmem:[#allocation10 + $0x58] sm:$0xff] }
0x16ba   : > { %1678 = vrot.lane.b32.xlu0 %v1676_v63, %s2879_s8 }
0x16bb   : > { %1689 = vrot.lane.b32.xlu1 %v1687_v0, %s2879_s8 }
0x172c   : > { %v1679_v5 = vpop.permute.xlu0 %1678 }
0x172d   : > { %v1690_v6 = vpop.permute.xlu1 %1689  ;;  %v1681_v7 = vadd.f32 %v1679_v5, %v1671_v3 }
0x172e   : > { %v1692_v8 = vadd.f32 %v1690_v6, %v1682_v4 }
0x172f   : > { %2602 = vtanh.f32 %v1681_v7 }
0x1730   : > { %2604 = vtanh.f32 %v1692_v8 }
0x1739   : > { %v2603_v10 = vpop.eup %2602 }
0x173a   : > { %v2605_v11 = vpop.eup %2604  ;;  %1695 = vrot.lane.b32.xlu0 %v2603_v10, %s2880_s10 }
0x173b   : > { %1701 = vrot.lane.b32.xlu1 %v2605_v11, %s2880_s10 }
0x17ac   : > { %v1696_v12 = vpop.permute.xlu0 %1695 }
0x17ad   : > { %v1702_v15 = vpop.permute.xlu1 %1701  ;;  %v1698_v49 = vmul.f32 %v2599_v61, %v1696_v12  ;;  %v1841_v61 = vld [vmem:[#allocation10 + $0x48] sm:$0xff] }
0x17ae   : > { %v1704_v17 = vmul.f32 %v2601_v59, %v1702_v15  ;;  %v2360_v62 = vpack.c.bf16 %v1841_v61, %v1840_v58  ;;  %v1842_v59 = vld [vmem:[#allocation10 + $0x50] sm:$0xff] }
0x17af   : > { %v1726_v35 = vrot.slane %v1698_v49, 1  ;;  %1706 = vrot.lane.b32.xlu1 %v1698_v49, %s2881_s22  ;;  %v2363_v63 = vpack.c.bf16 %v1843_v60, %v1842_v59 }
0x17b0   : > { %v1756_v20 = vsel %vm1728_vm3, %v1704_v17, %v1742_v16  ;;  %1710 = vrot.lane.b32.xlu0 %v1704_v17, %s2880_s10 }
0x17b1   : > { %v1757_v23 = vsel %vm1730_vm4, %v1756_v20, %v1744_v36  ;;  %v1741_v24 = vsel %vm1740_vm9, %v1739_v13, %v1726_v35 }
0x17b2   : > { %v1758_v26 = vsel %vm1732_vm5, %v1757_v23, %v1746_v18 }
0x17b3   : > { %1764 = vrot.lane.b32.xlu1 %v1741_v24, %s2881_s22  ;;  %v1759_v19 = vsel %vm1734_vm6, %v1758_v26, %v1748_v21 }
0x17b4   : > { %v1760_v28 = vsel %vm1736_vm7, %v1759_v19, %v1750_v25 }
0x17b5   : > { %v1761_v38 = vsel %vm1738_vm8, %v1760_v28, %v1752_v29 }
0x17b6   : > { %v1762_v30 = vsel %vm1740_vm9, %v1761_v38, %v1754_v27 }
0x17b7   : > { %1768 = vrot.lane.b32.xlu0 %v1762_v30, %s2880_s10 }
0x1821   : > { %v1707_v32 = vpop.permute.xlu1 %1706 }
0x1822   : > { %v1711_v53 = vpop.permute.xlu0 %1710 }
0x1823   : > { %v1713_v33 = vsel %vm776_vm2, %v1707_v32, %v1711_v53 }
0x1824   : > { %v1775_v9 = vrot.slane %v1713_v33, %v495_v2  ;;  %v1832_v2 = vld [vmem:[#allocation10] sm:$0xff] }
0x1825   : > { %v1765_v48 = vpop.permute.xlu1 %1764  ;;  %v2348_v45 = vpack.c.bf16 %v1833_v43, %v1832_v2 }
0x1827   : > { %2349 = vmatpush3.bf16.msra.mxu1 %v2348_v45 }
0x1828   : > { %2350 = vmatprep.subr.bf16.mxu1 %v2875_v22 }
0x1829   : > { %v1769_v34 = vpop.permute.xlu0 %1768 }
0x182a   : > { %v3485_v52 = vsel %vm776_vm2, %v1765_v48, %v1769_v34 }
0x182b   : > { %v1814_v31 = vsel %vm504_vm0, %v3485_v52, -inf  ;;  %v1776_v37 = vmul.f32 %v1775_v9, %v3485_v52  ;;  %2352 = vmatpush3.bf16.msra.mxu1 %v2351_v47  ;;  %v1805_v27 = vsel %vm504_vm0, %v3485_v52, 0.0 }
0x182c   : > { %v1815_v39 = vrot.slane %v1814_v31, 4  ;;  %2353 = vmatprep.subr.bf16.mxu1 %v2875_v22  ;;  %v1806_v28 = vrot.slane %v1805_v27, 4 }
0x182d   : > { %v1777_v14 = vsel %vm504_vm0, %v1776_v37, 0.0 }
0x182e   : > { %v1816_v13 = vmax.f32 %v1814_v31, %v1815_v39  ;;  %1778 = vadd.xlane.f32.xlu1 %v1777_v14  ;;  %v1807_v38 = vadd.f32 %v1806_v28, %v1805_v27 }
0x182f   : > { %2355 = vmatpush3.bf16.msra.mxu1 %v2354_v54 }
0x1830   : > { %v1817_v40 = vrot.slane %v1816_v13, 2  ;;  %2356 = vmatprep.subr.bf16.mxu1 %v2875_v22  ;;  %v1808_v30 = vrot.slane %v1807_v38, 2 }
0x1832   : > { %v1818_v41 = vmax.f32 %v1816_v13, %v1817_v40  ;;  %v1809_v32 = vadd.f32 %v1808_v30, %v1807_v38 }
0x1833   : > { %2358 = vmatpush3.bf16.msra.mxu1 %v2357_v57 }
0x1834   : > { %v1819_v42 = vrot.slane %v1818_v41, 1  ;;  %2359 = vmatprep.subr.bf16.mxu1 %v2875_v22  ;;  %v1810_v53 = vrot.slane %v1809_v32, 1 }
0x1836   : > { %v1820_v1 = vmax.f32 %v1818_v41, %v1819_v42  ;;  %v1811_v33 = vadd.f32 %v1810_v53, %v1809_v32 }
0x1837   : > { %2361 = vmatpush3.bf16.msra.mxu1 %v2360_v62 }
0x1838   : > { %1822 = vrot.lane.b32.xlu0 %v1820_v1, %s2880_s10  ;;  %2362 = vmatprep.subr.bf16.mxu1 %v2875_v22  ;;  %v1813_v48 = vmul.f32 0.125, %v1811_v33 }
0x183b   : > { %2364 = vmatpush3.bf16.msra.mxu1 %v2363_v63 }
0x18aa   : > { %v1823_v9 = vpop.permute.xlu0 %1822 }
0x18ab   : > { %v1829_v34 = vsel %vm504_vm0, %v1813_v48, %v1823_v9 }
0x18bb   : > { %v1779_v0 = vpop.xlane.xlu1 %1778 }
0x18bc   : > { %v1780_v3 = vrot.slane %v1779_v0, 4 }
0x18be   : > { %v1781_v4 = vmax.f32 %v1779_v0, %v1780_v3 }
0x18c0   : > { %v1782_v5 = vrot.slane %v1781_v4, 2 }
0x18c2   : > { %v1783_v6 = vmax.f32 %v1781_v4, %v1782_v5 }
0x18c4   : > { %v1784_v7 = vrot.slane %v1783_v6, 1 }
0x18c6   : > { %v1785_v8 = vmax.f32 %v1783_v6, %v1784_v7 }
0x18c8   : > { %v1786_v10 = vsub.f32 %v1779_v0, %v1785_v8 }
0x18ca   : > { %v1787_v11 = vmul.f32 1.442695, %v1786_v10 }
0x18cc   : > { %2606 = vpow2.f32 %v1787_v11 }
0x18d6   : > { %v2607_v12 = vpop.eup %2606 }
0x18d7   : > { %v1789_v15 = vrot.slane %v2607_v12, 4 }
0x18d9   : > { %v1790_v49 = vadd.f32 %v2607_v12, %v1789_v15 }
0x18db   : > { %v1791_v16 = vrot.slane %v1790_v49, 2 }
0x18dd   : > { %v1792_v17 = vadd.f32 %v1791_v16, %v1790_v49 }
0x18df   : > { %v1793_v36 = vrot.slane %v1792_v17, 1 }
0x18e1   : > { %v1794_v35 = vadd.f32 %v1793_v36, %v1792_v17 }
0x18e3   : > { %2608 = vrcp.f32 %v1794_v35 }
0x18ed   : > { %v2609_v22 = vpop.eup %2608 }
0x18ee   : > { %v1796_v18 = vmul.f32 %v2609_v22, %v2607_v12 }
0x18f0   : > { %v1797_v20 = vmul.f32 %v1796_v18, %v3485_v52  ;;  %v1844_v52 = vld [vmem:[#allocation11] sm:$0x1] }
0x18f2   : > { %v1798_v21 = vsel %vm504_vm0, %v1797_v20, 0.0 }
0x18f3   : > { %v1799_v23 = vrot.slane %v1798_v21, 4 }
0x18f5   : > { %v1800_v24 = vadd.f32 %v1799_v23, %v1798_v21 }
0x18f7   : > { %v1801_v25 = vrot.slane %v1800_v24, 2 }
0x18f9   : > { %v1802_v26 = vadd.f32 %v1801_v25, %v1800_v24 }
0x18fb   : > { %v1803_v29 = vrot.slane %v1802_v26, 1 }
0x18fd   : > { %v1804_v19 = vadd.f32 %v1803_v29, %v1802_v26 }
0x18ff   : > { %1826 = vrot.lane.b32.xlu0 %v1804_v19, %s2882_s11 }
0x1971   : > { %v1827_v31 = vpop.permute.xlu0 %1826 }
0x1972   : > { %v1831_v37 = vsel %vm1830_vm10, %v1829_v34, %v1827_v31 }
0x1973   : > { %2291 = vmatmul.mubr.msk.f32.vlgmr.msra.gmra.mrb[6].mxu1 %vm1845_vm11, %v1831_v37 }
0x1a46   : > { %v1915_v39 = vpop.f32.mrb[6].mxu1 }
0x1a47   : > { %v1916_v14 = vadd.f32 %v1915_v39, %v1844_v52  ;;  %v2292_v13 = vpop.f32.mrb[7].mxu1 }
0x1a49   : > { %1919 = vst [vmem:[%s489_s19] sm:$0x1] %v1916_v14 }
0x1a4a   : > { %2795 = shalt.err (!%p2792_p8)
}
0x1a4b   : > { %s2796_s30 = scalar_lea.hbm %s3507_s24, 16  ;;  %s2800_s8 = scalar_lea.hbm %s3600_s28, 32 }
0x1a4c   : > { %p2797_p6 = scmp.ne.s32.totalorder %s3507_s24, %s2796_s30  ;;  %p2801_p5 = scmp.lt.u32.totalorder %s3507_s24, %s3600_s28 }
0x1a4d   : > { %p2802_p7 = scmp.lt.u32.totalorder %s2800_s8, %s2796_s30  ;;  %p2804_p1 = scmp.lt.u32.totalorder %s2796_s30, %s3507_s24 }
0x1a4e   : > { %p2798_p2 = pnand %p2797_p6, %p3601_p3 }
0x1a4f   : > { %p2803_p4 = por %p2802_p7, %p2801_p5 }
0x1a50   : > { %p2799_p12 = pneg %p2798_p2 }
0x1a51   : > { %p2805_p13 = por %p2804_p1, %p2803_p4 }
0x1a53   : > { %p2806_p0 = pnand %p2805_p13, %p2799_p12 }
0x1a55   : > { %2809 = shalt.err (!%p2806_p0)
}
0x1a56   : > { %2385 = dma.vmem_to_hbm [thread:$0]  (%p3601_p3), %s3509_s12, 16, %s3507_s24, %s1921_s15  }
0x1a57 PF: > { %s1945_s11 = sand.u32 1, %s2852_s17   ;;  %p3602_p10 = scmp.ne.s32.totalorder %s3590_s27, 0 }
0x1a58   : > { %p3603_p11 = scmp.ge.s32.totalorder %s2864_s20, 2  ;;  %s1946_s2 = scalar_lea.sflag [#allocation4], %s1945_s11 }
0x1a5a   : > { %p2408_p9 = pnand %p3603_p11, %p3602_p10 }
0x1a5c   : > { %2847 = dma.done.wait (!%p2408_p9), %s1946_s2, 16  }
0x1a5d   : > { %2849 = vsyncadd (!%p2408_p9), %s1946_s2, 4294967280  ;;  %s3604_s20 = sld [smem:[#allocation21_spill]]  ;;  %s3605_s19 = sld [smem:[#allocation20_spill]] }
0x1a5e   : > { %s3606_s9 = sld [smem:[#allocation22_spill]]  ;;  %s3607_s17 = smov %s2856_s18 }
0x1a63   : > { %p29_p8 = scmp.ge.s32.totalorder %s3604_s20, 4   ;;  %s3608_s18 = smov %s3605_s19 }
0x1a64   : > { %s3609_s19 = smov %s3606_s9 }
0x1a65   :  { %31 = sbr.rel (!%p29_p8) target bundleno = 15 (0xf), region = 138 }
0x1a6c   :  { %1950 = vsyncpa [#allocation3], 1 }
0x1a6d   :  { %1952 = vsyncpa [#allocation3 + $0x1], 1 }
0x1a6e   :  { %1953 = vsyncpa [#allocation6], 1 }
0x1a6f   :  { %1955 = vsyncpa [#allocation6 + $0x1], 1 }
0x1a70   :  { %1956 = vsyncpa [#allocation9], 1 }
0x1a71   :  { %1957 = vsyncpa [#allocation12], 1 }
0x1a72   :  { %1958 = vsyncpa [#allocation4], 1 }
0x1a73   :  { %1960 = vsyncpa [#allocation4 + $0x1], 1 }

</bundles_post_ra>
